<compile_context>
chip_gen: v7x
topology: tpu7x:2x2x1
jax: 0.10.0
libtpu: 0.0.40
codegen_flags: <defaults>
</compile_context>

<pallas_src>
import jax
import jax.numpy as jnp
from jax.experimental import pallas as pl
from jax.experimental.pallas import tpu as pltpu

LANES = 128   # TPU lane width
H = 10        # hidden width of the MLP


def mlp_kernel(x_ref, w1_ref, b1_ref, w2_ref, b2_ref, w3_ref, b3_ref, o_ref):
    """Lane-dense fused MLP over one batch tile.

    x_ref / o_ref : [TR, 128] batch slab (batch elements on sublane+lane axes).
    Weights live in SMEM and are read as scalars:
      w1_ref: (10,)    fc1 weight (in=1 -> out=10)
      b1_ref: (10,)
      w2_ref: (10,10)  fc2 weight, [in, out] layout
      b2_ref: (10,)
      w3_ref: (10,)    fc3 weight (in=10 -> out=1)
      b3_ref: (1,)
    All layers are VPU scalar-broadcast FMAs; the MXU is never touched.
    """
    x = x_ref[...].astype(jnp.float32)                                   # [TR, 128]

    # fc1 + relu: h1[k] = relu(w1[k] * x + b1[k])   (K = 1 -> outer product)
    h1 = [jnp.maximum(x * w1_ref[k] + b1_ref[k], 0.0) for k in range(H)]

    # fc2 + relu: h2[f] = relu(sum_k w2[k, f] * h1[k] + b2[f])   (statically unrolled 10x10)
    h2 = []
    for f in range(H):
        acc = h1[0] * w2_ref[0, f] + b2_ref[f]
        for k in range(1, H):
            acc = acc + h1[k] * w2_ref[k, f]
        h2.append(jnp.maximum(acc, 0.0))

    # fc3: out = sum_f w3[f] * h2[f] + b3            (N = 1 -> multiply + accumulate)
    out = h2[0] * w3_ref[0] + b3_ref[0]
    for f in range(1, H):
        out = out + h2[f] * w3_ref[f]

    o_ref[...] = out.astype(o_ref.dtype)


def my_mlp_forward(x, params, *, block_rows=512):
    """Forward pass of myMLP. x: [B, 1] -> [B, 1] (same math as the PyTorch module).

    `block_rows` is the number of 128-wide slab rows per grid step (must be a multiple of 8);
    each block is block_rows*128 batch elements.
    """
    assert x.ndim == 2 and x.shape[1] == 1, "expected x of shape [B, 1]"
    assert block_rows % 8 == 0, "block_rows must be a multiple of 8 (sublane constraint)"
    w1, b1, w2, b2, w3, b3 = params            # w*: [in, out], b*: [1, out]
    B = x.shape[0]
    out_dtype = x.dtype

    # ---- layout plumbing: put batch on the (sublane, lane) axes ---------------------------
    R = -(-B // LANES)                         # rows of the [R, 128] batch slab
    tr = min(block_rows, R)                    # tile rows (== R -> full-extent block)
    Rp = -(-R // tr) * tr                      # pad rows so the grid divides evenly
    Bp = Rp * LANES
    x_slab = jnp.pad(x.reshape(B), (0, Bp - B)).reshape(Rp, LANES)

    # ---- SMEM-resident scalar weights ------------------------------------------------------
    w1s = w1.reshape(H).astype(jnp.float32)    # (10,)
    b1s = b1.reshape(H).astype(jnp.float32)    # (10,)
    w2s = w2.astype(jnp.float32)               # (10, 10) [in, out]
    b2s = b2.reshape(H).astype(jnp.float32)    # (10,)
    w3s = w3.reshape(H).astype(jnp.float32)    # (10,)
    b3s = b3.reshape(1).astype(jnp.float32)    # (1,)

    smem = pl.BlockSpec(memory_space=pltpu.MemorySpace.SMEM)
    grid = (Rp // tr,)

    out_slab = pl.pallas_call(
        mlp_kernel,
        out_shape=jax.ShapeDtypeStruct((Rp, LANES), out_dtype),
        grid_spec=pltpu.PrefetchScalarGridSpec(
            num_scalar_prefetch=0,
            grid=grid,
            in_specs=[
                pl.BlockSpec((tr, LANES), lambda i: (i, 0)),   # x: pipelined batch tiles
                smem, smem, smem, smem, smem, smem,            # weights: load-once scalars
            ],
            out_specs=pl.BlockSpec((tr, LANES), lambda i: (i, 0)),
        ),
        compiler_params=pltpu.CompilerParams(
            dimension_semantics=("parallel",),   # independent batch tiles (2 TCs on v7x)
        ),
    )(x_slab, w1s, b1s, w2s, b2s, w3s, b3s)

    return out_slab.reshape(Bp, 1)[:B]


def init_params(key):
    # Deterministic init mimicking torch.nn.Linear default: U(-1/sqrt(fan_in), +1/sqrt(fan_in)).
    ks = jax.random.split(key, 6)

    def lin(kw, kb, fan_in, fan_out):
        bound = 1.0 / jnp.sqrt(float(fan_in))
        w = jax.random.uniform(kw, (fan_in, fan_out), jnp.float32, -bound, bound)  # [in, out]
        b = jax.random.uniform(kb, (1, fan_out), jnp.float32, -bound, bound)       # [1, out]
        return w, b

    w1, b1 = lin(ks[0], ks[1], 1, 10)
    w2, b2 = lin(ks[2], ks[3], 10, 10)
    w3, b3 = lin(ks[4], ks[5], 10, 1)
    return (w1, b1, w2, b2, w3, b3)


def _reference(x, params):
    # Pure-JAX reference (exact f32 matmuls so it matches the kernel's f32 VPU math).
    w1, b1, w2, b2, w3, b3 = params
    hp = jax.lax.Precision.HIGHEST
    r = jnp.maximum(jnp.dot(x, w1, precision=hp) + b1, 0.0)
    r = jnp.maximum(jnp.dot(r, w2, precision=hp) + b2, 0.0)
    return jnp.dot(r, w3, precision=hp) + b3


if __name__ == "__main__":
    key = jax.random.PRNGKey(0)
    k_param, k_x1, k_x2 = jax.random.split(key, 3)
    params = init_params(k_param)

    # Case 1: tiny batch (single padded tile).  Note: at B=8 the problem is a few hundred
    # bytes and plain XLA would match or beat the kernel; this path exists for completeness.
    x_small = jax.random.normal(k_x1, (8, 1), dtype=jnp.float32)
    out_small = jax.block_until_ready(my_mlp_forward(x_small, params))
    ref_small = _reference(x_small, params)
    assert out_small.shape == (8, 1)
    assert jnp.allclose(out_small, ref_small, atol=1e-5, rtol=1e-5)

    # Case 2: larger batch with a multi-step pipelined grid (small tile to exercise tiling
    # and the pad/slice path: B=2000 -> 16 slab rows -> 2 grid steps of 8 rows).
    x_big = jax.random.normal(k_x2, (2000, 1), dtype=jnp.float32)
    out_big = jax.block_until_ready(my_mlp_forward(x_big, params, block_rows=8))
    ref_big = _reference(x_big, params)
    assert out_big.shape == (2000, 1)
    assert jnp.allclose(out_big, ref_big, atol=1e-5, rtol=1e-5)

    print("KERNEL_OK")
</pallas_src>

<mosaic_0001>
module attributes {stable_mosaic.version = 11 : i64} {
  func.func @mlp_kernel(%arg0: i32, %arg1: memref<1x128xf32, #tpu.memory_space<vmem>>, %arg2: memref<10xf32, #tpu.memory_space<smem>>, %arg3: memref<10xf32, #tpu.memory_space<smem>>, %arg4: memref<10x10xf32, #tpu.memory_space<smem>>, %arg5: memref<10xf32, #tpu.memory_space<smem>>, %arg6: memref<10xf32, #tpu.memory_space<smem>>, %arg7: memref<1xf32, #tpu.memory_space<smem>>, %arg8: memref<1x128xf32, #tpu.memory_space<vmem>>) attributes {dimension_semantics = [#tpu.dimension_semantics<parallel>], iteration_bounds = array<i64: 1>, scalar_prefetch = 0 : i64, scratch_operands = 0 : i64, tpu.core_type = #tpu.core_type<tc>, window_params = [{transform_indices = @transform_0, window_bounds = array<i64: 1, 128>}, {transform_indices = @transform_1, window_bounds = array<i64: 10>}, {transform_indices = @transform_2, window_bounds = array<i64: 10>}, {transform_indices = @transform_3, window_bounds = array<i64: 10, 10>}, {transform_indices = @transform_4, window_bounds = array<i64: 10>}, {transform_indices = @transform_5, window_bounds = array<i64: 10>}, {transform_indices = @transform_6, window_bounds = array<i64: 1>}, {transform_indices = @transform_7, window_bounds = array<i64: 1, 128>}]} {
    %c0 = arith.constant 0 : index
    %c0_0 = arith.constant 0 : index
    %0 = vector.load %arg1[%c0, %c0_0] : memref<1x128xf32, #tpu.memory_space<vmem>>, vector<1x128xf32>
    %c0_1 = arith.constant 0 : index
    %1 = memref.load %arg2[%c0_1] : memref<10xf32, #tpu.memory_space<smem>>
    %2 = vector.broadcast %1 : f32 to vector<1x128xf32>
    %3 = arith.mulf %0, %2 : vector<1x128xf32>
    %c0_2 = arith.constant 0 : index
    %4 = memref.load %arg3[%c0_2] : memref<10xf32, #tpu.memory_space<smem>>
    %5 = vector.broadcast %4 : f32 to vector<1x128xf32>
    %6 = arith.addf %3, %5 : vector<1x128xf32>
    %cst = arith.constant 0.000000e+00 : f32
    %7 = vector.broadcast %cst : f32 to vector<1x128xf32>
    %8 = arith.maximumf %6, %7 : vector<1x128xf32>
    %c1 = arith.constant 1 : index
    %9 = memref.load %arg2[%c1] : memref<10xf32, #tpu.memory_space<smem>>
    %10 = vector.broadcast %9 : f32 to vector<1x128xf32>
    %11 = arith.mulf %0, %10 : vector<1x128xf32>
    %c1_3 = arith.constant 1 : index
    %12 = memref.load %arg3[%c1_3] : memref<10xf32, #tpu.memory_space<smem>>
    %13 = vector.broadcast %12 : f32 to vector<1x128xf32>
    %14 = arith.addf %11, %13 : vector<1x128xf32>
    %cst_4 = arith.constant 0.000000e+00 : f32
    %15 = vector.broadcast %cst_4 : f32 to vector<1x128xf32>
    %16 = arith.maximumf %14, %15 : vector<1x128xf32>
    %c2 = arith.constant 2 : index
    %17 = memref.load %arg2[%c2] : memref<10xf32, #tpu.memory_space<smem>>
    %18 = vector.broadcast %17 : f32 to vector<1x128xf32>
    %19 = arith.mulf %0, %18 : vector<1x128xf32>
    %c2_5 = arith.constant 2 : index
    %20 = memref.load %arg3[%c2_5] : memref<10xf32, #tpu.memory_space<smem>>
    %21 = vector.broadcast %20 : f32 to vector<1x128xf32>
    %22 = arith.addf %19, %21 : vector<1x128xf32>
    %cst_6 = arith.constant 0.000000e+00 : f32
    %23 = vector.broadcast %cst_6 : f32 to vector<1x128xf32>
    %24 = arith.maximumf %22, %23 : vector<1x128xf32>
    %c3 = arith.constant 3 : index
    %25 = memref.load %arg2[%c3] : memref<10xf32, #tpu.memory_space<smem>>
    %26 = vector.broadcast %25 : f32 to vector<1x128xf32>
    %27 = arith.mulf %0, %26 : vector<1x128xf32>
    %c3_7 = arith.constant 3 : index
    %28 = memref.load %arg3[%c3_7] : memref<10xf32, #tpu.memory_space<smem>>
    %29 = vector.broadcast %28 : f32 to vector<1x128xf32>
    %30 = arith.addf %27, %29 : vector<1x128xf32>
    %cst_8 = arith.constant 0.000000e+00 : f32
    %31 = vector.broadcast %cst_8 : f32 to vector<1x128xf32>
    %32 = arith.maximumf %30, %31 : vector<1x128xf32>
    %c4 = arith.constant 4 : index
    %33 = memref.load %arg2[%c4] : memref<10xf32, #tpu.memory_space<smem>>
    %34 = vector.broadcast %33 : f32 to vector<1x128xf32>
    %35 = arith.mulf %0, %34 : vector<1x128xf32>
    %c4_9 = arith.constant 4 : index
    %36 = memref.load %arg3[%c4_9] : memref<10xf32, #tpu.memory_space<smem>>
    %37 = vector.broadcast %36 : f32 to vector<1x128xf32>
    %38 = arith.addf %35, %37 : vector<1x128xf32>
    %cst_10 = arith.constant 0.000000e+00 : f32
    %39 = vector.broadcast %cst_10 : f32 to vector<1x128xf32>
    %40 = arith.maximumf %38, %39 : vector<1x128xf32>
    %c5 = arith.constant 5 : index
    %41 = memref.load %arg2[%c5] : memref<10xf32, #tpu.memory_space<smem>>
    %42 = vector.broadcast %41 : f32 to vector<1x128xf32>
    %43 = arith.mulf %0, %42 : vector<1x128xf32>
    %c5_11 = arith.constant 5 : index
    %44 = memref.load %arg3[%c5_11] : memref<10xf32, #tpu.memory_space<smem>>
    %45 = vector.broadcast %44 : f32 to vector<1x128xf32>
    %46 = arith.addf %43, %45 : vector<1x128xf32>
    %cst_12 = arith.constant 0.000000e+00 : f32
    %47 = vector.broadcast %cst_12 : f32 to vector<1x128xf32>
    %48 = arith.maximumf %46, %47 : vector<1x128xf32>
    %c6 = arith.constant 6 : index
    %49 = memref.load %arg2[%c6] : memref<10xf32, #tpu.memory_space<smem>>
    %50 = vector.broadcast %49 : f32 to vector<1x128xf32>
    %51 = arith.mulf %0, %50 : vector<1x128xf32>
    %c6_13 = arith.constant 6 : index
    %52 = memref.load %arg3[%c6_13] : memref<10xf32, #tpu.memory_space<smem>>
    %53 = vector.broadcast %52 : f32 to vector<1x128xf32>
    %54 = arith.addf %51, %53 : vector<1x128xf32>
    %cst_14 = arith.constant 0.000000e+00 : f32
    %55 = vector.broadcast %cst_14 : f32 to vector<1x128xf32>
    %56 = arith.maximumf %54, %55 : vector<1x128xf32>
    %c7 = arith.constant 7 : index
    %57 = memref.load %arg2[%c7] : memref<10xf32, #tpu.memory_space<smem>>
    %58 = vector.broadcast %57 : f32 to vector<1x128xf32>
    %59 = arith.mulf %0, %58 : vector<1x128xf32>
    %c7_15 = arith.constant 7 : index
    %60 = memref.load %arg3[%c7_15] : memref<10xf32, #tpu.memory_space<smem>>
    %61 = vector.broadcast %60 : f32 to vector<1x128xf32>
    %62 = arith.addf %59, %61 : vector<1x128xf32>
    %cst_16 = arith.constant 0.000000e+00 : f32
    %63 = vector.broadcast %cst_16 : f32 to vector<1x128xf32>
    %64 = arith.maximumf %62, %63 : vector<1x128xf32>
    %c8 = arith.constant 8 : index
    %65 = memref.load %arg2[%c8] : memref<10xf32, #tpu.memory_space<smem>>
    %66 = vector.broadcast %65 : f32 to vector<1x128xf32>
    %67 = arith.mulf %0, %66 : vector<1x128xf32>
    %c8_17 = arith.constant 8 : index
    %68 = memref.load %arg3[%c8_17] : memref<10xf32, #tpu.memory_space<smem>>
    %69 = vector.broadcast %68 : f32 to vector<1x128xf32>
    %70 = arith.addf %67, %69 : vector<1x128xf32>
    %cst_18 = arith.constant 0.000000e+00 : f32
    %71 = vector.broadcast %cst_18 : f32 to vector<1x128xf32>
    %72 = arith.maximumf %70, %71 : vector<1x128xf32>
    %c9 = arith.constant 9 : index
    %73 = memref.load %arg2[%c9] : memref<10xf32, #tpu.memory_space<smem>>
    %74 = vector.broadcast %73 : f32 to vector<1x128xf32>
    %75 = arith.mulf %0, %74 : vector<1x128xf32>
    %c9_19 = arith.constant 9 : index
    %76 = memref.load %arg3[%c9_19] : memref<10xf32, #tpu.memory_space<smem>>
    %77 = vector.broadcast %76 : f32 to vector<1x128xf32>
    %78 = arith.addf %75, %77 : vector<1x128xf32>
    %cst_20 = arith.constant 0.000000e+00 : f32
    %79 = vector.broadcast %cst_20 : f32 to vector<1x128xf32>
    %80 = arith.maximumf %78, %79 : vector<1x128xf32>
    %c0_21 = arith.constant 0 : index
    %c0_22 = arith.constant 0 : index
    %81 = memref.load %arg4[%c0_21, %c0_22] : memref<10x10xf32, #tpu.memory_space<smem>>
    %82 = vector.broadcast %81 : f32 to vector<1x128xf32>
    %83 = arith.mulf %8, %82 : vector<1x128xf32>
    %c0_23 = arith.constant 0 : index
    %84 = memref.load %arg5[%c0_23] : memref<10xf32, #tpu.memory_space<smem>>
    %85 = vector.broadcast %84 : f32 to vector<1x128xf32>
    %86 = arith.addf %83, %85 : vector<1x128xf32>
    %c1_24 = arith.constant 1 : index
    %c0_25 = arith.constant 0 : index
    %87 = memref.load %arg4[%c1_24, %c0_25] : memref<10x10xf32, #tpu.memory_space<smem>>
    %88 = vector.broadcast %87 : f32 to vector<1x128xf32>
    %89 = arith.mulf %16, %88 : vector<1x128xf32>
    %90 = arith.addf %86, %89 : vector<1x128xf32>
    %c2_26 = arith.constant 2 : index
    %c0_27 = arith.constant 0 : index
    %91 = memref.load %arg4[%c2_26, %c0_27] : memref<10x10xf32, #tpu.memory_space<smem>>
    %92 = vector.broadcast %91 : f32 to vector<1x128xf32>
    %93 = arith.mulf %24, %92 : vector<1x128xf32>
    %94 = arith.addf %90, %93 : vector<1x128xf32>
    %c3_28 = arith.constant 3 : index
    %c0_29 = arith.constant 0 : index
    %95 = memref.load %arg4[%c3_28, %c0_29] : memref<10x10xf32, #tpu.memory_space<smem>>
    %96 = vector.broadcast %95 : f32 to vector<1x128xf32>
    %97 = arith.mulf %32, %96 : vector<1x128xf32>
    %98 = arith.addf %94, %97 : vector<1x128xf32>
    %c4_30 = arith.constant 4 : index
    %c0_31 = arith.constant 0 : index
    %99 = memref.load %arg4[%c4_30, %c0_31] : memref<10x10xf32, #tpu.memory_space<smem>>
    %100 = vector.broadcast %99 : f32 to vector<1x128xf32>
    %101 = arith.mulf %40, %100 : vector<1x128xf32>
    %102 = arith.addf %98, %101 : vector<1x128xf32>
    %c5_32 = arith.constant 5 : index
    %c0_33 = arith.constant 0 : index
    %103 = memref.load %arg4[%c5_32, %c0_33] : memref<10x10xf32, #tpu.memory_space<smem>>
    %104 = vector.broadcast %103 : f32 to vector<1x128xf32>
    %105 = arith.mulf %48, %104 : vector<1x128xf32>
    %106 = arith.addf %102, %105 : vector<1x128xf32>
    %c6_34 = arith.constant 6 : index
    %c0_35 = arith.constant 0 : index
    %107 = memref.load %arg4[%c6_34, %c0_35] : memref<10x10xf32, #tpu.memory_space<smem>>
    %108 = vector.broadcast %107 : f32 to vector<1x128xf32>
    %109 = arith.mulf %56, %108 : vector<1x128xf32>
    %110 = arith.addf %106, %109 : vector<1x128xf32>
    %c7_36 = arith.constant 7 : index
    %c0_37 = arith.constant 0 : index
    %111 = memref.load %arg4[%c7_36, %c0_37] : memref<10x10xf32, #tpu.memory_space<smem>>
    %112 = vector.broadcast %111 : f32 to vector<1x128xf32>
    %113 = arith.mulf %64, %112 : vector<1x128xf32>
    %114 = arith.addf %110, %113 : vector<1x128xf32>
    %c8_38 = arith.constant 8 : index
    %c0_39 = arith.constant 0 : index
    %115 = memref.load %arg4[%c8_38, %c0_39] : memref<10x10xf32, #tpu.memory_space<smem>>
    %116 = vector.broadcast %115 : f32 to vector<1x128xf32>
    %117 = arith.mulf %72, %116 : vector<1x128xf32>
    %118 = arith.addf %114, %117 : vector<1x128xf32>
    %c9_40 = arith.constant 9 : index
    %c0_41 = arith.constant 0 : index
    %119 = memref.load %arg4[%c9_40, %c0_41] : memref<10x10xf32, #tpu.memory_space<smem>>
    %120 = vector.broadcast %119 : f32 to vector<1x128xf32>
    %121 = arith.mulf %80, %120 : vector<1x128xf32>
    %122 = arith.addf %118, %121 : vector<1x128xf32>
    %cst_42 = arith.constant 0.000000e+00 : f32
    %123 = vector.broadcast %cst_42 : f32 to vector<1x128xf32>
    %124 = arith.maximumf %122, %123 : vector<1x128xf32>
    %c0_43 = arith.constant 0 : index
    %c1_44 = arith.constant 1 : index
    %125 = memref.load %arg4[%c0_43, %c1_44] : memref<10x10xf32, #tpu.memory_space<smem>>
    %126 = vector.broadcast %125 : f32 to vector<1x128xf32>
    %127 = arith.mulf %8, %126 : vector<1x128xf32>
    %c1_45 = arith.constant 1 : index
    %128 = memref.load %arg5[%c1_45] : memref<10xf32, #tpu.memory_space<smem>>
    %129 = vector.broadcast %128 : f32 to vector<1x128xf32>
    %130 = arith.addf %127, %129 : vector<1x128xf32>
    %c1_46 = arith.constant 1 : index
    %c1_47 = arith.constant 1 : index
    %131 = memref.load %arg4[%c1_46, %c1_47] : memref<10x10xf32, #tpu.memory_space<smem>>
    %132 = vector.broadcast %131 : f32 to vector<1x128xf32>
    %133 = arith.mulf %16, %132 : vector<1x128xf32>
    %134 = arith.addf %130, %133 : vector<1x128xf32>
    %c2_48 = arith.constant 2 : index
    %c1_49 = arith.constant 1 : index
    %135 = memref.load %arg4[%c2_48, %c1_49] : memref<10x10xf32, #tpu.memory_space<smem>>
    %136 = vector.broadcast %135 : f32 to vector<1x128xf32>
    %137 = arith.mulf %24, %136 : vector<1x128xf32>
    %138 = arith.addf %134, %137 : vector<1x128xf32>
    %c3_50 = arith.constant 3 : index
    %c1_51 = arith.constant 1 : index
    %139 = memref.load %arg4[%c3_50, %c1_51] : memref<10x10xf32, #tpu.memory_space<smem>>
    %140 = vector.broadcast %139 : f32 to vector<1x128xf32>
    %141 = arith.mulf %32, %140 : vector<1x128xf32>
    %142 = arith.addf %138, %141 : vector<1x128xf32>
    %c4_52 = arith.constant 4 : index
    %c1_53 = arith.constant 1 : index
    %143 = memref.load %arg4[%c4_52, %c1_53] : memref<10x10xf32, #tpu.memory_space<smem>>
    %144 = vector.broadcast %143 : f32 to vector<1x128xf32>
    %145 = arith.mulf %40, %144 : vector<1x128xf32>
    %146 = arith.addf %142, %145 : vector<1x128xf32>
    %c5_54 = arith.constant 5 : index
    %c1_55 = arith.constant 1 : index
    %147 = memref.load %arg4[%c5_54, %c1_55] : memref<10x10xf32, #tpu.memory_space<smem>>
    %148 = vector.broadcast %147 : f32 to vector<1x128xf32>
    %149 = arith.mulf %48, %148 : vector<1x128xf32>
    %150 = arith.addf %146, %149 : vector<1x128xf32>
    %c6_56 = arith.constant 6 : index
    %c1_57 = arith.constant 1 : index
    %151 = memref.load %arg4[%c6_56, %c1_57] : memref<10x10xf32, #tpu.memory_space<smem>>
    %152 = vector.broadcast %151 : f32 to vector<1x128xf32>
    %153 = arith.mulf %56, %152 : vector<1x128xf32>
    %154 = arith.addf %150, %153 : vector<1x128xf32>
    %c7_58 = arith.constant 7 : index
    %c1_59 = arith.constant 1 : index
    %155 = memref.load %arg4[%c7_58, %c1_59] : memref<10x10xf32, #tpu.memory_space<smem>>
    %156 = vector.broadcast %155 : f32 to vector<1x128xf32>
    %157 = arith.mulf %64, %156 : vector<1x128xf32>
    %158 = arith.addf %154, %157 : vector<1x128xf32>
    %c8_60 = arith.constant 8 : index
    %c1_61 = arith.constant 1 : index
    %159 = memref.load %arg4[%c8_60, %c1_61] : memref<10x10xf32, #tpu.memory_space<smem>>
    %160 = vector.broadcast %159 : f32 to vector<1x128xf32>
    %161 = arith.mulf %72, %160 : vector<1x128xf32>
    %162 = arith.addf %158, %161 : vector<1x128xf32>
    %c9_62 = arith.constant 9 : index
    %c1_63 = arith.constant 1 : index
    %163 = memref.load %arg4[%c9_62, %c1_63] : memref<10x10xf32, #tpu.memory_space<smem>>
    %164 = vector.broadcast %163 : f32 to vector<1x128xf32>
    %165 = arith.mulf %80, %164 : vector<1x128xf32>
    %166 = arith.addf %162, %165 : vector<1x128xf32>
    %cst_64 = arith.constant 0.000000e+00 : f32
    %167 = vector.broadcast %cst_64 : f32 to vector<1x128xf32>
    %168 = arith.maximumf %166, %167 : vector<1x128xf32>
    %c0_65 = arith.constant 0 : index
    %c2_66 = arith.constant 2 : index
    %169 = memref.load %arg4[%c0_65, %c2_66] : memref<10x10xf32, #tpu.memory_space<smem>>
    %170 = vector.broadcast %169 : f32 to vector<1x128xf32>
    %171 = arith.mulf %8, %170 : vector<1x128xf32>
    %c2_67 = arith.constant 2 : index
    %172 = memref.load %arg5[%c2_67] : memref<10xf32, #tpu.memory_space<smem>>
    %173 = vector.broadcast %172 : f32 to vector<1x128xf32>
    %174 = arith.addf %171, %173 : vector<1x128xf32>
    %c1_68 = arith.constant 1 : index
    %c2_69 = arith.constant 2 : index
    %175 = memref.load %arg4[%c1_68, %c2_69] : memref<10x10xf32, #tpu.memory_space<smem>>
    %176 = vector.broadcast %175 : f32 to vector<1x128xf32>
    %177 = arith.mulf %16, %176 : vector<1x128xf32>
    %178 = arith.addf %174, %177 : vector<1x128xf32>
    %c2_70 = arith.constant 2 : index
    %c2_71 = arith.constant 2 : index
    %179 = memref.load %arg4[%c2_70, %c2_71] : memref<10x10xf32, #tpu.memory_space<smem>>
    %180 = vector.broadcast %179 : f32 to vector<1x128xf32>
    %181 = arith.mulf %24, %180 : vector<1x128xf32>
    %182 = arith.addf %178, %181 : vector<1x128xf32>
    %c3_72 = arith.constant 3 : index
    %c2_73 = arith.constant 2 : index
    %183 = memref.load %arg4[%c3_72, %c2_73] : memref<10x10xf32, #tpu.memory_space<smem>>
    %184 = vector.broadcast %183 : f32 to vector<1x128xf32>
    %185 = arith.mulf %32, %184 : vector<1x128xf32>
    %186 = arith.addf %182, %185 : vector<1x128xf32>
    %c4_74 = arith.constant 4 : index
    %c2_75 = arith.constant 2 : index
    %187 = memref.load %arg4[%c4_74, %c2_75] : memref<10x10xf32, #tpu.memory_space<smem>>
    %188 = vector.broadcast %187 : f32 to vector<1x128xf32>
    %189 = arith.mulf %40, %188 : vector<1x128xf32>
    %190 = arith.addf %186, %189 : vector<1x128xf32>
    %c5_76 = arith.constant 5 : index
    %c2_77 = arith.constant 2 : index
    %191 = memref.load %arg4[%c5_76, %c2_77] : memref<10x10xf32, #tpu.memory_space<smem>>
    %192 = vector.broadcast %191 : f32 to vector<1x128xf32>
    %193 = arith.mulf %48, %192 : vector<1x128xf32>
    %194 = arith.addf %190, %193 : vector<1x128xf32>
    %c6_78 = arith.constant 6 : index
    %c2_79 = arith.constant 2 : index
    %195 = memref.load %arg4[%c6_78, %c2_79] : memref<10x10xf32, #tpu.memory_space<smem>>
    %196 = vector.broadcast %195 : f32 to vector<1x128xf32>
    %197 = arith.mulf %56, %196 : vector<1x128xf32>
    %198 = arith.addf %194, %197 : vector<1x128xf32>
    %c7_80 = arith.constant 7 : index
    %c2_81 = arith.constant 2 : index
    %199 = memref.load %arg4[%c7_80, %c2_81] : memref<10x10xf32, #tpu.memory_space<smem>>
    %200 = vector.broadcast %199 : f32 to vector<1x128xf32>
    %201 = arith.mulf %64, %200 : vector<1x128xf32>
    %202 = arith.addf %198, %201 : vector<1x128xf32>
    %c8_82 = arith.constant 8 : index
    %c2_83 = arith.constant 2 : index
    %203 = memref.load %arg4[%c8_82, %c2_83] : memref<10x10xf32, #tpu.memory_space<smem>>
    %204 = vector.broadcast %203 : f32 to vector<1x128xf32>
    %205 = arith.mulf %72, %204 : vector<1x128xf32>
    %206 = arith.addf %202, %205 : vector<1x128xf32>
    %c9_84 = arith.constant 9 : index
    %c2_85 = arith.constant 2 : index
    %207 = memref.load %arg4[%c9_84, %c2_85] : memref<10x10xf32, #tpu.memory_space<smem>>
    %208 = vector.broadcast %207 : f32 to vector<1x128xf32>
    %209 = arith.mulf %80, %208 : vector<1x128xf32>
    %210 = arith.addf %206, %209 : vector<1x128xf32>
    %cst_86 = arith.constant 0.000000e+00 : f32
    %211 = vector.broadcast %cst_86 : f32 to vector<1x128xf32>
    %212 = arith.maximumf %210, %211 : vector<1x128xf32>
    %c0_87 = arith.constant 0 : index
    %c3_88 = arith.constant 3 : index
    %213 = memref.load %arg4[%c0_87, %c3_88] : memref<10x10xf32, #tpu.memory_space<smem>>
    %214 = vector.broadcast %213 : f32 to vector<1x128xf32>
    %215 = arith.mulf %8, %214 : vector<1x128xf32>
    %c3_89 = arith.constant 3 : index
    %216 = memref.load %arg5[%c3_89] : memref<10xf32, #tpu.memory_space<smem>>
    %217 = vector.broadcast %216 : f32 to vector<1x128xf32>
    %218 = arith.addf %215, %217 : vector<1x128xf32>
    %c1_90 = arith.constant 1 : index
    %c3_91 = arith.constant 3 : index
    %219 = memref.load %arg4[%c1_90, %c3_91] : memref<10x10xf32, #tpu.memory_space<smem>>
    %220 = vector.broadcast %219 : f32 to vector<1x128xf32>
    %221 = arith.mulf %16, %220 : vector<1x128xf32>
    %222 = arith.addf %218, %221 : vector<1x128xf32>
    %c2_92 = arith.constant 2 : index
    %c3_93 = arith.constant 3 : index
    %223 = memref.load %arg4[%c2_92, %c3_93] : memref<10x10xf32, #tpu.memory_space<smem>>
    %224 = vector.broadcast %223 : f32 to vector<1x128xf32>
    %225 = arith.mulf %24, %224 : vector<1x128xf32>
    %226 = arith.addf %222, %225 : vector<1x128xf32>
    %c3_94 = arith.constant 3 : index
    %c3_95 = arith.constant 3 : index
    %227 = memref.load %arg4[%c3_94, %c3_95] : memref<10x10xf32, #tpu.memory_space<smem>>
    %228 = vector.broadcast %227 : f32 to vector<1x128xf32>
    %229 = arith.mulf %32, %228 : vector<1x128xf32>
    %230 = arith.addf %226, %229 : vector<1x128xf32>
    %c4_96 = arith.constant 4 : index
    %c3_97 = arith.constant 3 : index
    %231 = memref.load %arg4[%c4_96, %c3_97] : memref<10x10xf32, #tpu.memory_space<smem>>
    %232 = vector.broadcast %231 : f32 to vector<1x128xf32>
    %233 = arith.mulf %40, %232 : vector<1x128xf32>
    %234 = arith.addf %230, %233 : vector<1x128xf32>
    %c5_98 = arith.constant 5 : index
    %c3_99 = arith.constant 3 : index
    %235 = memref.load %arg4[%c5_98, %c3_99] : memref<10x10xf32, #tpu.memory_space<smem>>
    %236 = vector.broadcast %235 : f32 to vector<1x128xf32>
    %237 = arith.mulf %48, %236 : vector<1x128xf32>
    %238 = arith.addf %234, %237 : vector<1x128xf32>
    %c6_100 = arith.constant 6 : index
    %c3_101 = arith.constant 3 : index
    %239 = memref.load %arg4[%c6_100, %c3_101] : memref<10x10xf32, #tpu.memory_space<smem>>
    %240 = vector.broadcast %239 : f32 to vector<1x128xf32>
    %241 = arith.mulf %56, %240 : vector<1x128xf32>
    %242 = arith.addf %238, %241 : vector<1x128xf32>
    %c7_102 = arith.constant 7 : index
    %c3_103 = arith.constant 3 : index
    %243 = memref.load %arg4[%c7_102, %c3_103] : memref<10x10xf32, #tpu.memory_space<smem>>
    %244 = vector.broadcast %243 : f32 to vector<1x128xf32>
    %245 = arith.mulf %64, %244 : vector<1x128xf32>
    %246 = arith.addf %242, %245 : vector<1x128xf32>
    %c8_104 = arith.constant 8 : index
    %c3_105 = arith.constant 3 : index
    %247 = memref.load %arg4[%c8_104, %c3_105] : memref<10x10xf32, #tpu.memory_space<smem>>
    %248 = vector.broadcast %247 : f32 to vector<1x128xf32>
    %249 = arith.mulf %72, %248 : vector<1x128xf32>
    %250 = arith.addf %246, %249 : vector<1x128xf32>
    %c9_106 = arith.constant 9 : index
    %c3_107 = arith.constant 3 : index
    %251 = memref.load %arg4[%c9_106, %c3_107] : memref<10x10xf32, #tpu.memory_space<smem>>
    %252 = vector.broadcast %251 : f32 to vector<1x128xf32>
    %253 = arith.mulf %80, %252 : vector<1x128xf32>
    %254 = arith.addf %250, %253 : vector<1x128xf32>
    %cst_108 = arith.constant 0.000000e+00 : f32
    %255 = vector.broadcast %cst_108 : f32 to vector<1x128xf32>
    %256 = arith.maximumf %254, %255 : vector<1x128xf32>
    %c0_109 = arith.constant 0 : index
    %c4_110 = arith.constant 4 : index
    %257 = memref.load %arg4[%c0_109, %c4_110] : memref<10x10xf32, #tpu.memory_space<smem>>
    %258 = vector.broadcast %257 : f32 to vector<1x128xf32>
    %259 = arith.mulf %8, %258 : vector<1x128xf32>
    %c4_111 = arith.constant 4 : index
    %260 = memref.load %arg5[%c4_111] : memref<10xf32, #tpu.memory_space<smem>>
    %261 = vector.broadcast %260 : f32 to vector<1x128xf32>
    %262 = arith.addf %259, %261 : vector<1x128xf32>
    %c1_112 = arith.constant 1 : index
    %c4_113 = arith.constant 4 : index
    %263 = memref.load %arg4[%c1_112, %c4_113] : memref<10x10xf32, #tpu.memory_space<smem>>
    %264 = vector.broadcast %263 : f32 to vector<1x128xf32>
    %265 = arith.mulf %16, %264 : vector<1x128xf32>
    %266 = arith.addf %262, %265 : vector<1x128xf32>
    %c2_114 = arith.constant 2 : index
    %c4_115 = arith.constant 4 : index
    %267 = memref.load %arg4[%c2_114, %c4_115] : memref<10x10xf32, #tpu.memory_space<smem>>
    %268 = vector.broadcast %267 : f32 to vector<1x128xf32>
    %269 = arith.mulf %24, %268 : vector<1x128xf32>
    %270 = arith.addf %266, %269 : vector<1x128xf32>
    %c3_116 = arith.constant 3 : index
    %c4_117 = arith.constant 4 : index
    %271 = memref.load %arg4[%c3_116, %c4_117] : memref<10x10xf32, #tpu.memory_space<smem>>
    %272 = vector.broadcast %271 : f32 to vector<1x128xf32>
    %273 = arith.mulf %32, %272 : vector<1x128xf32>
    %274 = arith.addf %270, %273 : vector<1x128xf32>
    %c4_118 = arith.constant 4 : index
    %c4_119 = arith.constant 4 : index
    %275 = memref.load %arg4[%c4_118, %c4_119] : memref<10x10xf32, #tpu.memory_space<smem>>
    %276 = vector.broadcast %275 : f32 to vector<1x128xf32>
    %277 = arith.mulf %40, %276 : vector<1x128xf32>
    %278 = arith.addf %274, %277 : vector<1x128xf32>
    %c5_120 = arith.constant 5 : index
    %c4_121 = arith.constant 4 : index
    %279 = memref.load %arg4[%c5_120, %c4_121] : memref<10x10xf32, #tpu.memory_space<smem>>
    %280 = vector.broadcast %279 : f32 to vector<1x128xf32>
    %281 = arith.mulf %48, %280 : vector<1x128xf32>
    %282 = arith.addf %278, %281 : vector<1x128xf32>
    %c6_122 = arith.constant 6 : index
    %c4_123 = arith.constant 4 : index
    %283 = memref.load %arg4[%c6_122, %c4_123] : memref<10x10xf32, #tpu.memory_space<smem>>
    %284 = vector.broadcast %283 : f32 to vector<1x128xf32>
    %285 = arith.mulf %56, %284 : vector<1x128xf32>
    %286 = arith.addf %282, %285 : vector<1x128xf32>
    %c7_124 = arith.constant 7 : index
    %c4_125 = arith.constant 4 : index
    %287 = memref.load %arg4[%c7_124, %c4_125] : memref<10x10xf32, #tpu.memory_space<smem>>
    %288 = vector.broadcast %287 : f32 to vector<1x128xf32>
    %289 = arith.mulf %64, %288 : vector<1x128xf32>
    %290 = arith.addf %286, %289 : vector<1x128xf32>
    %c8_126 = arith.constant 8 : index
    %c4_127 = arith.constant 4 : index
    %291 = memref.load %arg4[%c8_126, %c4_127] : memref<10x10xf32, #tpu.memory_space<smem>>
    %292 = vector.broadcast %291 : f32 to vector<1x128xf32>
    %293 = arith.mulf %72, %292 : vector<1x128xf32>
    %294 = arith.addf %290, %293 : vector<1x128xf32>
    %c9_128 = arith.constant 9 : index
    %c4_129 = arith.constant 4 : index
    %295 = memref.load %arg4[%c9_128, %c4_129] : memref<10x10xf32, #tpu.memory_space<smem>>
    %296 = vector.broadcast %295 : f32 to vector<1x128xf32>
    %297 = arith.mulf %80, %296 : vector<1x128xf32>
    %298 = arith.addf %294, %297 : vector<1x128xf32>
    %cst_130 = arith.constant 0.000000e+00 : f32
    %299 = vector.broadcast %cst_130 : f32 to vector<1x128xf32>
    %300 = arith.maximumf %298, %299 : vector<1x128xf32>
    %c0_131 = arith.constant 0 : index
    %c5_132 = arith.constant 5 : index
    %301 = memref.load %arg4[%c0_131, %c5_132] : memref<10x10xf32, #tpu.memory_space<smem>>
    %302 = vector.broadcast %301 : f32 to vector<1x128xf32>
    %303 = arith.mulf %8, %302 : vector<1x128xf32>
    %c5_133 = arith.constant 5 : index
    %304 = memref.load %arg5[%c5_133] : memref<10xf32, #tpu.memory_space<smem>>
    %305 = vector.broadcast %304 : f32 to vector<1x128xf32>
    %306 = arith.addf %303, %305 : vector<1x128xf32>
    %c1_134 = arith.constant 1 : index
    %c5_135 = arith.constant 5 : index
    %307 = memref.load %arg4[%c1_134, %c5_135] : memref<10x10xf32, #tpu.memory_space<smem>>
    %308 = vector.broadcast %307 : f32 to vector<1x128xf32>
    %309 = arith.mulf %16, %308 : vector<1x128xf32>
    %310 = arith.addf %306, %309 : vector<1x128xf32>
    %c2_136 = arith.constant 2 : index
    %c5_137 = arith.constant 5 : index
    %311 = memref.load %arg4[%c2_136, %c5_137] : memref<10x10xf32, #tpu.memory_space<smem>>
    %312 = vector.broadcast %311 : f32 to vector<1x128xf32>
    %313 = arith.mulf %24, %312 : vector<1x128xf32>
    %314 = arith.addf %310, %313 : vector<1x128xf32>
    %c3_138 = arith.constant 3 : index
    %c5_139 = arith.constant 5 : index
    %315 = memref.load %arg4[%c3_138, %c5_139] : memref<10x10xf32, #tpu.memory_space<smem>>
    %316 = vector.broadcast %315 : f32 to vector<1x128xf32>
    %317 = arith.mulf %32, %316 : vector<1x128xf32>
    %318 = arith.addf %314, %317 : vector<1x128xf32>
    %c4_140 = arith.constant 4 : index
    %c5_141 = arith.constant 5 : index
    %319 = memref.load %arg4[%c4_140, %c5_141] : memref<10x10xf32, #tpu.memory_space<smem>>
    %320 = vector.broadcast %319 : f32 to vector<1x128xf32>
    %321 = arith.mulf %40, %320 : vector<1x128xf32>
    %322 = arith.addf %318, %321 : vector<1x128xf32>
    %c5_142 = arith.constant 5 : index
    %c5_143 = arith.constant 5 : index
    %323 = memref.load %arg4[%c5_142, %c5_143] : memref<10x10xf32, #tpu.memory_space<smem>>
    %324 = vector.broadcast %323 : f32 to vector<1x128xf32>
    %325 = arith.mulf %48, %324 : vector<1x128xf32>
    %326 = arith.addf %322, %325 : vector<1x128xf32>
    %c6_144 = arith.constant 6 : index
    %c5_145 = arith.constant 5 : index
    %327 = memref.load %arg4[%c6_144, %c5_145] : memref<10x10xf32, #tpu.memory_space<smem>>
    %328 = vector.broadcast %327 : f32 to vector<1x128xf32>
    %329 = arith.mulf %56, %328 : vector<1x128xf32>
    %330 = arith.addf %326, %329 : vector<1x128xf32>
    %c7_146 = arith.constant 7 : index
    %c5_147 = arith.constant 5 : index
    %331 = memref.load %arg4[%c7_146, %c5_147] : memref<10x10xf32, #tpu.memory_space<smem>>
    %332 = vector.broadcast %331 : f32 to vector<1x128xf32>
    %333 = arith.mulf %64, %332 : vector<1x128xf32>
    %334 = arith.addf %330, %333 : vector<1x128xf32>
    %c8_148 = arith.constant 8 : index
    %c5_149 = arith.constant 5 : index
    %335 = memref.load %arg4[%c8_148, %c5_149] : memref<10x10xf32, #tpu.memory_space<smem>>
    %336 = vector.broadcast %335 : f32 to vector<1x128xf32>
    %337 = arith.mulf %72, %336 : vector<1x128xf32>
    %338 = arith.addf %334, %337 : vector<1x128xf32>
    %c9_150 = arith.constant 9 : index
    %c5_151 = arith.constant 5 : index
    %339 = memref.load %arg4[%c9_150, %c5_151] : memref<10x10xf32, #tpu.memory_space<smem>>
    %340 = vector.broadcast %339 : f32 to vector<1x128xf32>
    %341 = arith.mulf %80, %340 : vector<1x128xf32>
    %342 = arith.addf %338, %341 : vector<1x128xf32>
    %cst_152 = arith.constant 0.000000e+00 : f32
    %343 = vector.broadcast %cst_152 : f32 to vector<1x128xf32>
    %344 = arith.maximumf %342, %343 : vector<1x128xf32>
    %c0_153 = arith.constant 0 : index
    %c6_154 = arith.constant 6 : index
    %345 = memref.load %arg4[%c0_153, %c6_154] : memref<10x10xf32, #tpu.memory_space<smem>>
    %346 = vector.broadcast %345 : f32 to vector<1x128xf32>
    %347 = arith.mulf %8, %346 : vector<1x128xf32>
    %c6_155 = arith.constant 6 : index
    %348 = memref.load %arg5[%c6_155] : memref<10xf32, #tpu.memory_space<smem>>
    %349 = vector.broadcast %348 : f32 to vector<1x128xf32>
    %350 = arith.addf %347, %349 : vector<1x128xf32>
    %c1_156 = arith.constant 1 : index
    %c6_157 = arith.constant 6 : index
    %351 = memref.load %arg4[%c1_156, %c6_157] : memref<10x10xf32, #tpu.memory_space<smem>>
    %352 = vector.broadcast %351 : f32 to vector<1x128xf32>
    %353 = arith.mulf %16, %352 : vector<1x128xf32>
    %354 = arith.addf %350, %353 : vector<1x128xf32>
    %c2_158 = arith.constant 2 : index
    %c6_159 = arith.constant 6 : index
    %355 = memref.load %arg4[%c2_158, %c6_159] : memref<10x10xf32, #tpu.memory_space<smem>>
    %356 = vector.broadcast %355 : f32 to vector<1x128xf32>
    %357 = arith.mulf %24, %356 : vector<1x128xf32>
    %358 = arith.addf %354, %357 : vector<1x128xf32>
    %c3_160 = arith.constant 3 : index
    %c6_161 = arith.constant 6 : index
    %359 = memref.load %arg4[%c3_160, %c6_161] : memref<10x10xf32, #tpu.memory_space<smem>>
    %360 = vector.broadcast %359 : f32 to vector<1x128xf32>
    %361 = arith.mulf %32, %360 : vector<1x128xf32>
    %362 = arith.addf %358, %361 : vector<1x128xf32>
    %c4_162 = arith.constant 4 : index
    %c6_163 = arith.constant 6 : index
    %363 = memref.load %arg4[%c4_162, %c6_163] : memref<10x10xf32, #tpu.memory_space<smem>>
    %364 = vector.broadcast %363 : f32 to vector<1x128xf32>
    %365 = arith.mulf %40, %364 : vector<1x128xf32>
    %366 = arith.addf %362, %365 : vector<1x128xf32>
    %c5_164 = arith.constant 5 : index
    %c6_165 = arith.constant 6 : index
    %367 = memref.load %arg4[%c5_164, %c6_165] : memref<10x10xf32, #tpu.memory_space<smem>>
    %368 = vector.broadcast %367 : f32 to vector<1x128xf32>
    %369 = arith.mulf %48, %368 : vector<1x128xf32>
    %370 = arith.addf %366, %369 : vector<1x128xf32>
    %c6_166 = arith.constant 6 : index
    %c6_167 = arith.constant 6 : index
    %371 = memref.load %arg4[%c6_166, %c6_167] : memref<10x10xf32, #tpu.memory_space<smem>>
    %372 = vector.broadcast %371 : f32 to vector<1x128xf32>
    %373 = arith.mulf %56, %372 : vector<1x128xf32>
    %374 = arith.addf %370, %373 : vector<1x128xf32>
    %c7_168 = arith.constant 7 : index
    %c6_169 = arith.constant 6 : index
    %375 = memref.load %arg4[%c7_168, %c6_169] : memref<10x10xf32, #tpu.memory_space<smem>>
    %376 = vector.broadcast %375 : f32 to vector<1x128xf32>
    %377 = arith.mulf %64, %376 : vector<1x128xf32>
    %378 = arith.addf %374, %377 : vector<1x128xf32>
    %c8_170 = arith.constant 8 : index
    %c6_171 = arith.constant 6 : index
    %379 = memref.load %arg4[%c8_170, %c6_171] : memref<10x10xf32, #tpu.memory_space<smem>>
    %380 = vector.broadcast %379 : f32 to vector<1x128xf32>
    %381 = arith.mulf %72, %380 : vector<1x128xf32>
    %382 = arith.addf %378, %381 : vector<1x128xf32>
    %c9_172 = arith.constant 9 : index
    %c6_173 = arith.constant 6 : index
    %383 = memref.load %arg4[%c9_172, %c6_173] : memref<10x10xf32, #tpu.memory_space<smem>>
    %384 = vector.broadcast %383 : f32 to vector<1x128xf32>
    %385 = arith.mulf %80, %384 : vector<1x128xf32>
    %386 = arith.addf %382, %385 : vector<1x128xf32>
    %cst_174 = arith.constant 0.000000e+00 : f32
    %387 = vector.broadcast %cst_174 : f32 to vector<1x128xf32>
    %388 = arith.maximumf %386, %387 : vector<1x128xf32>
    %c0_175 = arith.constant 0 : index
    %c7_176 = arith.constant 7 : index
    %389 = memref.load %arg4[%c0_175, %c7_176] : memref<10x10xf32, #tpu.memory_space<smem>>
    %390 = vector.broadcast %389 : f32 to vector<1x128xf32>
    %391 = arith.mulf %8, %390 : vector<1x128xf32>
    %c7_177 = arith.constant 7 : index
    %392 = memref.load %arg5[%c7_177] : memref<10xf32, #tpu.memory_space<smem>>
    %393 = vector.broadcast %392 : f32 to vector<1x128xf32>
    %394 = arith.addf %391, %393 : vector<1x128xf32>
    %c1_178 = arith.constant 1 : index
    %c7_179 = arith.constant 7 : index
    %395 = memref.load %arg4[%c1_178, %c7_179] : memref<10x10xf32, #tpu.memory_space<smem>>
    %396 = vector.broadcast %395 : f32 to vector<1x128xf32>
    %397 = arith.mulf %16, %396 : vector<1x128xf32>
    %398 = arith.addf %394, %397 : vector<1x128xf32>
    %c2_180 = arith.constant 2 : index
    %c7_181 = arith.constant 7 : index
    %399 = memref.load %arg4[%c2_180, %c7_181] : memref<10x10xf32, #tpu.memory_space<smem>>
    %400 = vector.broadcast %399 : f32 to vector<1x128xf32>
    %401 = arith.mulf %24, %400 : vector<1x128xf32>
    %402 = arith.addf %398, %401 : vector<1x128xf32>
    %c3_182 = arith.constant 3 : index
    %c7_183 = arith.constant 7 : index
    %403 = memref.load %arg4[%c3_182, %c7_183] : memref<10x10xf32, #tpu.memory_space<smem>>
    %404 = vector.broadcast %403 : f32 to vector<1x128xf32>
    %405 = arith.mulf %32, %404 : vector<1x128xf32>
    %406 = arith.addf %402, %405 : vector<1x128xf32>
    %c4_184 = arith.constant 4 : index
    %c7_185 = arith.constant 7 : index
    %407 = memref.load %arg4[%c4_184, %c7_185] : memref<10x10xf32, #tpu.memory_space<smem>>
    %408 = vector.broadcast %407 : f32 to vector<1x128xf32>
    %409 = arith.mulf %40, %408 : vector<1x128xf32>
    %410 = arith.addf %406, %409 : vector<1x128xf32>
    %c5_186 = arith.constant 5 : index
    %c7_187 = arith.constant 7 : index
    %411 = memref.load %arg4[%c5_186, %c7_187] : memref<10x10xf32, #tpu.memory_space<smem>>
    %412 = vector.broadcast %411 : f32 to vector<1x128xf32>
    %413 = arith.mulf %48, %412 : vector<1x128xf32>
    %414 = arith.addf %410, %413 : vector<1x128xf32>
    %c6_188 = arith.constant 6 : index
    %c7_189 = arith.constant 7 : index
    %415 = memref.load %arg4[%c6_188, %c7_189] : memref<10x10xf32, #tpu.memory_space<smem>>
    %416 = vector.broadcast %415 : f32 to vector<1x128xf32>
    %417 = arith.mulf %56, %416 : vector<1x128xf32>
    %418 = arith.addf %414, %417 : vector<1x128xf32>
    %c7_190 = arith.constant 7 : index
    %c7_191 = arith.constant 7 : index
    %419 = memref.load %arg4[%c7_190, %c7_191] : memref<10x10xf32, #tpu.memory_space<smem>>
    %420 = vector.broadcast %419 : f32 to vector<1x128xf32>
    %421 = arith.mulf %64, %420 : vector<1x128xf32>
    %422 = arith.addf %418, %421 : vector<1x128xf32>
    %c8_192 = arith.constant 8 : index
    %c7_193 = arith.constant 7 : index
    %423 = memref.load %arg4[%c8_192, %c7_193] : memref<10x10xf32, #tpu.memory_space<smem>>
    %424 = vector.broadcast %423 : f32 to vector<1x128xf32>
    %425 = arith.mulf %72, %424 : vector<1x128xf32>
    %426 = arith.addf %422, %425 : vector<1x128xf32>
    %c9_194 = arith.constant 9 : index
    %c7_195 = arith.constant 7 : index
    %427 = memref.load %arg4[%c9_194, %c7_195] : memref<10x10xf32, #tpu.memory_space<smem>>
    %428 = vector.broadcast %427 : f32 to vector<1x128xf32>
    %429 = arith.mulf %80, %428 : vector<1x128xf32>
    %430 = arith.addf %426, %429 : vector<1x128xf32>
    %cst_196 = arith.constant 0.000000e+00 : f32
    %431 = vector.broadcast %cst_196 : f32 to vector<1x128xf32>
    %432 = arith.maximumf %430, %431 : vector<1x128xf32>
    %c0_197 = arith.constant 0 : index
    %c8_198 = arith.constant 8 : index
    %433 = memref.load %arg4[%c0_197, %c8_198] : memref<10x10xf32, #tpu.memory_space<smem>>
    %434 = vector.broadcast %433 : f32 to vector<1x128xf32>
    %435 = arith.mulf %8, %434 : vector<1x128xf32>
    %c8_199 = arith.constant 8 : index
    %436 = memref.load %arg5[%c8_199] : memref<10xf32, #tpu.memory_space<smem>>
    %437 = vector.broadcast %436 : f32 to vector<1x128xf32>
    %438 = arith.addf %435, %437 : vector<1x128xf32>
    %c1_200 = arith.constant 1 : index
    %c8_201 = arith.constant 8 : index
    %439 = memref.load %arg4[%c1_200, %c8_201] : memref<10x10xf32, #tpu.memory_space<smem>>
    %440 = vector.broadcast %439 : f32 to vector<1x128xf32>
    %441 = arith.mulf %16, %440 : vector<1x128xf32>
    %442 = arith.addf %438, %441 : vector<1x128xf32>
    %c2_202 = arith.constant 2 : index
    %c8_203 = arith.constant 8 : index
    %443 = memref.load %arg4[%c2_202, %c8_203] : memref<10x10xf32, #tpu.memory_space<smem>>
    %444 = vector.broadcast %443 : f32 to vector<1x128xf32>
    %445 = arith.mulf %24, %444 : vector<1x128xf32>
    %446 = arith.addf %442, %445 : vector<1x128xf32>
    %c3_204 = arith.constant 3 : index
    %c8_205 = arith.constant 8 : index
    %447 = memref.load %arg4[%c3_204, %c8_205] : memref<10x10xf32, #tpu.memory_space<smem>>
    %448 = vector.broadcast %447 : f32 to vector<1x128xf32>
    %449 = arith.mulf %32, %448 : vector<1x128xf32>
    %450 = arith.addf %446, %449 : vector<1x128xf32>
    %c4_206 = arith.constant 4 : index
    %c8_207 = arith.constant 8 : index
    %451 = memref.load %arg4[%c4_206, %c8_207] : memref<10x10xf32, #tpu.memory_space<smem>>
    %452 = vector.broadcast %451 : f32 to vector<1x128xf32>
    %453 = arith.mulf %40, %452 : vector<1x128xf32>
    %454 = arith.addf %450, %453 : vector<1x128xf32>
    %c5_208 = arith.constant 5 : index
    %c8_209 = arith.constant 8 : index
    %455 = memref.load %arg4[%c5_208, %c8_209] : memref<10x10xf32, #tpu.memory_space<smem>>
    %456 = vector.broadcast %455 : f32 to vector<1x128xf32>
    %457 = arith.mulf %48, %456 : vector<1x128xf32>
    %458 = arith.addf %454, %457 : vector<1x128xf32>
    %c6_210 = arith.constant 6 : index
    %c8_211 = arith.constant 8 : index
    %459 = memref.load %arg4[%c6_210, %c8_211] : memref<10x10xf32, #tpu.memory_space<smem>>
    %460 = vector.broadcast %459 : f32 to vector<1x128xf32>
    %461 = arith.mulf %56, %460 : vector<1x128xf32>
    %462 = arith.addf %458, %461 : vector<1x128xf32>
    %c7_212 = arith.constant 7 : index
    %c8_213 = arith.constant 8 : index
    %463 = memref.load %arg4[%c7_212, %c8_213] : memref<10x10xf32, #tpu.memory_space<smem>>
    %464 = vector.broadcast %463 : f32 to vector<1x128xf32>
    %465 = arith.mulf %64, %464 : vector<1x128xf32>
    %466 = arith.addf %462, %465 : vector<1x128xf32>
    %c8_214 = arith.constant 8 : index
    %c8_215 = arith.constant 8 : index
    %467 = memref.load %arg4[%c8_214, %c8_215] : memref<10x10xf32, #tpu.memory_space<smem>>
    %468 = vector.broadcast %467 : f32 to vector<1x128xf32>
    %469 = arith.mulf %72, %468 : vector<1x128xf32>
    %470 = arith.addf %466, %469 : vector<1x128xf32>
    %c9_216 = arith.constant 9 : index
    %c8_217 = arith.constant 8 : index
    %471 = memref.load %arg4[%c9_216, %c8_217] : memref<10x10xf32, #tpu.memory_space<smem>>
    %472 = vector.broadcast %471 : f32 to vector<1x128xf32>
    %473 = arith.mulf %80, %472 : vector<1x128xf32>
    %474 = arith.addf %470, %473 : vector<1x128xf32>
    %cst_218 = arith.constant 0.000000e+00 : f32
    %475 = vector.broadcast %cst_218 : f32 to vector<1x128xf32>
    %476 = arith.maximumf %474, %475 : vector<1x128xf32>
    %c0_219 = arith.constant 0 : index
    %c9_220 = arith.constant 9 : index
    %477 = memref.load %arg4[%c0_219, %c9_220] : memref<10x10xf32, #tpu.memory_space<smem>>
    %478 = vector.broadcast %477 : f32 to vector<1x128xf32>
    %479 = arith.mulf %8, %478 : vector<1x128xf32>
    %c9_221 = arith.constant 9 : index
    %480 = memref.load %arg5[%c9_221] : memref<10xf32, #tpu.memory_space<smem>>
    %481 = vector.broadcast %480 : f32 to vector<1x128xf32>
    %482 = arith.addf %479, %481 : vector<1x128xf32>
    %c1_222 = arith.constant 1 : index
    %c9_223 = arith.constant 9 : index
    %483 = memref.load %arg4[%c1_222, %c9_223] : memref<10x10xf32, #tpu.memory_space<smem>>
    %484 = vector.broadcast %483 : f32 to vector<1x128xf32>
    %485 = arith.mulf %16, %484 : vector<1x128xf32>
    %486 = arith.addf %482, %485 : vector<1x128xf32>
    %c2_224 = arith.constant 2 : index
    %c9_225 = arith.constant 9 : index
    %487 = memref.load %arg4[%c2_224, %c9_225] : memref<10x10xf32, #tpu.memory_space<smem>>
    %488 = vector.broadcast %487 : f32 to vector<1x128xf32>
    %489 = arith.mulf %24, %488 : vector<1x128xf32>
    %490 = arith.addf %486, %489 : vector<1x128xf32>
    %c3_226 = arith.constant 3 : index
    %c9_227 = arith.constant 9 : index
    %491 = memref.load %arg4[%c3_226, %c9_227] : memref<10x10xf32, #tpu.memory_space<smem>>
    %492 = vector.broadcast %491 : f32 to vector<1x128xf32>
    %493 = arith.mulf %32, %492 : vector<1x128xf32>
    %494 = arith.addf %490, %493 : vector<1x128xf32>
    %c4_228 = arith.constant 4 : index
    %c9_229 = arith.constant 9 : index
    %495 = memref.load %arg4[%c4_228, %c9_229] : memref<10x10xf32, #tpu.memory_space<smem>>
    %496 = vector.broadcast %495 : f32 to vector<1x128xf32>
    %497 = arith.mulf %40, %496 : vector<1x128xf32>
    %498 = arith.addf %494, %497 : vector<1x128xf32>
    %c5_230 = arith.constant 5 : index
    %c9_231 = arith.constant 9 : index
    %499 = memref.load %arg4[%c5_230, %c9_231] : memref<10x10xf32, #tpu.memory_space<smem>>
    %500 = vector.broadcast %499 : f32 to vector<1x128xf32>
    %501 = arith.mulf %48, %500 : vector<1x128xf32>
    %502 = arith.addf %498, %501 : vector<1x128xf32>
    %c6_232 = arith.constant 6 : index
    %c9_233 = arith.constant 9 : index
    %503 = memref.load %arg4[%c6_232, %c9_233] : memref<10x10xf32, #tpu.memory_space<smem>>
    %504 = vector.broadcast %503 : f32 to vector<1x128xf32>
    %505 = arith.mulf %56, %504 : vector<1x128xf32>
    %506 = arith.addf %502, %505 : vector<1x128xf32>
    %c7_234 = arith.constant 7 : index
    %c9_235 = arith.constant 9 : index
    %507 = memref.load %arg4[%c7_234, %c9_235] : memref<10x10xf32, #tpu.memory_space<smem>>
    %508 = vector.broadcast %507 : f32 to vector<1x128xf32>
    %509 = arith.mulf %64, %508 : vector<1x128xf32>
    %510 = arith.addf %506, %509 : vector<1x128xf32>
    %c8_236 = arith.constant 8 : index
    %c9_237 = arith.constant 9 : index
    %511 = memref.load %arg4[%c8_236, %c9_237] : memref<10x10xf32, #tpu.memory_space<smem>>
    %512 = vector.broadcast %511 : f32 to vector<1x128xf32>
    %513 = arith.mulf %72, %512 : vector<1x128xf32>
    %514 = arith.addf %510, %513 : vector<1x128xf32>
    %c9_238 = arith.constant 9 : index
    %c9_239 = arith.constant 9 : index
    %515 = memref.load %arg4[%c9_238, %c9_239] : memref<10x10xf32, #tpu.memory_space<smem>>
    %516 = vector.broadcast %515 : f32 to vector<1x128xf32>
    %517 = arith.mulf %80, %516 : vector<1x128xf32>
    %518 = arith.addf %514, %517 : vector<1x128xf32>
    %cst_240 = arith.constant 0.000000e+00 : f32
    %519 = vector.broadcast %cst_240 : f32 to vector<1x128xf32>
    %520 = arith.maximumf %518, %519 : vector<1x128xf32>
    %c0_241 = arith.constant 0 : index
    %521 = memref.load %arg6[%c0_241] : memref<10xf32, #tpu.memory_space<smem>>
    %522 = vector.broadcast %521 : f32 to vector<1x128xf32>
    %523 = arith.mulf %124, %522 : vector<1x128xf32>
    %c0_242 = arith.constant 0 : index
    %524 = memref.load %arg7[%c0_242] : memref<1xf32, #tpu.memory_space<smem>>
    %525 = vector.broadcast %524 : f32 to vector<1x128xf32>
    %526 = arith.addf %523, %525 : vector<1x128xf32>
    %c1_243 = arith.constant 1 : index
    %527 = memref.load %arg6[%c1_243] : memref<10xf32, #tpu.memory_space<smem>>
    %528 = vector.broadcast %527 : f32 to vector<1x128xf32>
    %529 = arith.mulf %168, %528 : vector<1x128xf32>
    %530 = arith.addf %526, %529 : vector<1x128xf32>
    %c2_244 = arith.constant 2 : index
    %531 = memref.load %arg6[%c2_244] : memref<10xf32, #tpu.memory_space<smem>>
    %532 = vector.broadcast %531 : f32 to vector<1x128xf32>
    %533 = arith.mulf %212, %532 : vector<1x128xf32>
    %534 = arith.addf %530, %533 : vector<1x128xf32>
    %c3_245 = arith.constant 3 : index
    %535 = memref.load %arg6[%c3_245] : memref<10xf32, #tpu.memory_space<smem>>
    %536 = vector.broadcast %535 : f32 to vector<1x128xf32>
    %537 = arith.mulf %256, %536 : vector<1x128xf32>
    %538 = arith.addf %534, %537 : vector<1x128xf32>
    %c4_246 = arith.constant 4 : index
    %539 = memref.load %arg6[%c4_246] : memref<10xf32, #tpu.memory_space<smem>>
    %540 = vector.broadcast %539 : f32 to vector<1x128xf32>
    %541 = arith.mulf %300, %540 : vector<1x128xf32>
    %542 = arith.addf %538, %541 : vector<1x128xf32>
    %c5_247 = arith.constant 5 : index
    %543 = memref.load %arg6[%c5_247] : memref<10xf32, #tpu.memory_space<smem>>
    %544 = vector.broadcast %543 : f32 to vector<1x128xf32>
    %545 = arith.mulf %344, %544 : vector<1x128xf32>
    %546 = arith.addf %542, %545 : vector<1x128xf32>
    %c6_248 = arith.constant 6 : index
    %547 = memref.load %arg6[%c6_248] : memref<10xf32, #tpu.memory_space<smem>>
    %548 = vector.broadcast %547 : f32 to vector<1x128xf32>
    %549 = arith.mulf %388, %548 : vector<1x128xf32>
    %550 = arith.addf %546, %549 : vector<1x128xf32>
    %c7_249 = arith.constant 7 : index
    %551 = memref.load %arg6[%c7_249] : memref<10xf32, #tpu.memory_space<smem>>
    %552 = vector.broadcast %551 : f32 to vector<1x128xf32>
    %553 = arith.mulf %432, %552 : vector<1x128xf32>
    %554 = arith.addf %550, %553 : vector<1x128xf32>
    %c8_250 = arith.constant 8 : index
    %555 = memref.load %arg6[%c8_250] : memref<10xf32, #tpu.memory_space<smem>>
    %556 = vector.broadcast %555 : f32 to vector<1x128xf32>
    %557 = arith.mulf %476, %556 : vector<1x128xf32>
    %558 = arith.addf %554, %557 : vector<1x128xf32>
    %c9_251 = arith.constant 9 : index
    %559 = memref.load %arg6[%c9_251] : memref<10xf32, #tpu.memory_space<smem>>
    %560 = vector.broadcast %559 : f32 to vector<1x128xf32>
    %561 = arith.mulf %520, %560 : vector<1x128xf32>
    %562 = arith.addf %558, %561 : vector<1x128xf32>
    %c0_252 = arith.constant 0 : index
    %c0_253 = arith.constant 0 : index
    %563 = vector.load %arg8[%c0_252, %c0_253] : memref<1x128xf32, #tpu.memory_space<vmem>>, vector<1x128xf32>
    tpu.vector_store %arg8[%c0_252, %c0_253], %562 {strides = array<i32>} : memref<1x128xf32, #tpu.memory_space<vmem>>, vector<1x128xf32>,
    return
  }
  func.func @transform_0(%arg0: i32) -> (i32, i32) {
    %c0_i32 = arith.constant 0 : i32
    %c0_i32_0 = arith.constant 0 : i32
    return %arg0, %c0_i32 : i32, i32
  }
  func.func @transform_1(%arg0: i32) -> i32 {
    %c0_i32 = arith.constant 0 : i32
    %c0_i32_0 = arith.constant 0 : i32
    return %c0_i32 : i32
  }
  func.func @transform_2(%arg0: i32) -> i32 {
    %c0_i32 = arith.constant 0 : i32
    %c0_i32_0 = arith.constant 0 : i32
    return %c0_i32 : i32
  }
  func.func @transform_3(%arg0: i32) -> (i32, i32) {
    %c0_i32 = arith.constant 0 : i32
    %c0_i32_0 = arith.constant 0 : i32
    %c0_i32_1 = arith.constant 0 : i32
    return %c0_i32, %c0_i32_0 : i32, i32
  }
  func.func @transform_4(%arg0: i32) -> i32 {
    %c0_i32 = arith.constant 0 : i32
    %c0_i32_0 = arith.constant 0 : i32
    return %c0_i32 : i32
  }
  func.func @transform_5(%arg0: i32) -> i32 {
    %c0_i32 = arith.constant 0 : i32
    %c0_i32_0 = arith.constant 0 : i32
    return %c0_i32 : i32
  }
  func.func @transform_6(%arg0: i32) -> i32 {
    %c0_i32 = arith.constant 0 : i32
    %c0_i32_0 = arith.constant 0 : i32
    return %c0_i32 : i32
  }
  func.func @transform_7(%arg0: i32) -> (i32, i32) {
    %c0_i32 = arith.constant 0 : i32
    %c0_i32_0 = arith.constant 0 : i32
    return %arg0, %c0_i32 : i32, i32
  }
}

</mosaic_0001>

<bundles_post_ra>
// kernel: tpu_custom_call.1
= control target key start
LH: loop header
LB: loop body
LE: loop exit
PB: predicated region body
PF: predicated region fallthrough
CT: control target
= control target key end

     0   :  { %13 = vsyncpa [#allocation6], 0  ;;  %s1541_s0 = inlined_call_operand.vmem [shape: f32[1,128], index: 0, kind: input, shape index: {}]   ;;  %s1542_s1 = inlined_call_operand.vmem [shape: f32[10], index: 1, kind: input, shape index: {}]   ;;  %s1543_s2 = inlined_call_operand.vmem [shape: f32[10], index: 2, kind: input, shape index: {}]   ;;  %s1544_s3 = inlined_call_operand.hbm [shape: f32[10,10], index: 3, kind: input, shape index: {}]   ;;  %s1545_s4 = inlined_call_operand.vmem [shape: f32[10], index: 4, kind: input, shape index: {}]   ;;  %s1546_s5 = inlined_call_operand.vmem [shape: f32[10], index: 5, kind: input, shape index: {}]   ;;  %s1547_s6 = inlined_call_operand.<no memory space> [shape: f32[1], index: 6, kind: input, shape index: {}]   ;;  %s1548_s7 = inlined_call_operand.hbm [shape: f32[1,128], index: 7, kind: output, shape index: {}]  }
   0x1   :  { %14 = vsyncpa [#allocation8], 0 }
   0x2   :  { %15 = vsyncpa [#allocation5], 0 }
   0x3   :  { %16 = vsyncpa [#allocation12], 0  ;;  %s36_s26 = sshll.u32 %s1543_s2, 4  ;;  %s37_s26 = int_to_ptr.vmem [resolvable:$true] %s36_s26 }
   0x4   :  { %17 = vsyncpa [#allocation4], 0  ;;  %s26_s29 = sshll.u32 %s1542_s1, 4  ;;  %s793_s30 = scalar_lea.vmem %s37_s26, 16  ;;  %s27_s29 = int_to_ptr.vmem [resolvable:$true] %s26_s29 }
   0x5   :  { %p794_p0 = scmp.ne.s32.totalorder %s37_s26, %s793_s30  ;;  %p798_p1 = scmp.lt.s32.totalorder %s37_s26, %s37_s26 }
   0x6   :  { %p799_p2 = scmp.lt.s32.totalorder %s793_s30, %s793_s30 }
   0x8   :  { %p800_p3 = por %p799_p2, %p798_p1 }
   0xa   :  { %p801_p4 = pnand %p800_p3, %p794_p0 }
   0xc   :  { %804 = shalt.err (!%p801_p4)
}
   0xd   :  { %s885_s8 = smov [#allocation7]   ;;  %s805_s9 = scalar_lea.vmem %s27_s29, 16 }
   0xe   :  { %39 = dma.vmem_to_smem %s37_s26, 16, %s885_s8, [#allocation8]  }
   0xf   :  { %p806_p5 = scmp.ne.s32.totalorder %s27_s29, %s805_s9  ;;  %p810_p6 = scmp.lt.s32.totalorder %s27_s29, %s27_s29 }
  0x10   :  { %p811_p7 = scmp.lt.s32.totalorder %s805_s9, %s805_s9 }
  0x12   :  { %p812_p8 = por %p811_p7, %p810_p6 }
  0x14   :  { %p813_p9 = pnand %p812_p8, %p806_p5 }
  0x16   :  { %816 = shalt.err (!%p813_p9)
}
  0x17   :  { %s886_s2 = smov [#allocation3]   ;;  %s56_s11 = sshll.u32 %s1545_s4, 4  ;;  %s57_s11 = int_to_ptr.vmem [resolvable:$true] %s56_s11 }
  0x18   :  { %29 = dma.vmem_to_smem %s27_s29, 16, %s886_s2, [#allocation6]  }
  0x19   :  { %s817_s14 = scalar_lea.hbm %s1544_s3, 256 }
  0x1a   :  { %p818_p10 = scmp.ne.s32.totalorder %s1544_s3, %s817_s14  ;;  %p821_p11 = scmp.lt.u32.totalorder %s817_s14, %s1544_s3 }
  0x1c   :  { %p823_p12 = pnand %p821_p11, %p818_p10 }
  0x1e   :  { %826 = shalt.err (!%p823_p12)
}
  0x1f   :  { %s887_s19 = smov [#allocation9]   ;;  %s888_s20 = smov 128  }
  0x20   :  { %s889_s21 = smov 8   ;;  %s827_s4 = scalar_lea.vmem %s57_s11, 16 }
  0x21   :  { %49 = dma.hbm_to_smem %s1544_s3, 256, %s887_s19, [#allocation5], %s888_s20, %s888_s20, %s889_s21  }
  0x22   :  { %p828_p13 = scmp.ne.s32.totalorder %s57_s11, %s827_s4  ;;  %p832_p0 = scmp.lt.s32.totalorder %s57_s11, %s57_s11 }
  0x23   :  { %p833_p1 = scmp.lt.s32.totalorder %s827_s4, %s827_s4 }
  0x25   :  { %p834_p2 = por %p833_p1, %p832_p0 }
  0x27   :  { %p835_p3 = pnand %p834_p2, %p828_p13 }
  0x29   :  { %838 = shalt.err (!%p835_p3)
}
  0x2a   :  { %s890_s24 = smov [#allocation10]   ;;  %s66_s27 = sshll.u32 %s1546_s5, 4  ;;  %s67_s27 = int_to_ptr.vmem [resolvable:$true] %s66_s27 }
  0x2b   :  { %59 = dma.vmem_to_smem %s57_s11, 16, %s890_s24, [#allocation8]  }
  0x2c   :  { %s839_s28 = scalar_lea.vmem %s67_s27, 16  ;;  %p844_p5 = scmp.lt.s32.totalorder %s67_s27, %s67_s27 }
  0x2d   :  { %p840_p4 = scmp.ne.s32.totalorder %s67_s27, %s839_s28  ;;  %p845_p6 = scmp.lt.s32.totalorder %s839_s28, %s839_s28 }
  0x2f   :  { %p846_p7 = por %p845_p6, %p844_p5 }
  0x31   :  { %p847_p8 = pnand %p846_p7, %p840_p4 }
  0x33   :  { %850 = shalt.err (!%p847_p8)
}
  0x34   :  { %s891_s3 = smov [#allocation11]  }
  0x35   :  { %69 = dma.vmem_to_smem %s67_s27, 16, %s891_s3, [#allocation12]  }
  0x36   :  { %873 = dma.done.wait [#allocation6], 16  }
  0x37   :  { %874 = vsyncadd [#allocation6], 4294967280 }
  0x38   :  { %875 = dma.done.wait [#allocation8], 16  }
  0x39   :  { %876 = vsyncadd [#allocation8], 4294967280 }
  0x3a   :  { %877 = dma.done.wait [#allocation5], 256  }
  0x3b   :  { %878 = vsyncadd [#allocation5], 4294967040 }
  0x3c   :  { %879 = dma.done.wait [#allocation8], 16  }
  0x3d   :  { %880 = vsyncadd [#allocation8], 4294967280 }
  0x3e   :  { %881 = dma.done.wait [#allocation12], 16  }
  0x3f   :  { %882 = vsyncadd [#allocation12], 4294967280 }
  0x40   :  { %87 = sfence }
  0x41   :  { %s89_s5 = sld [smem:[#allocation3]]  ;;  %s650_s30 = sld [smem:[#allocation3 + $0x1]]  ;;  %v964_v0 = vld [vmem:[%s1541_s0] sm:$0x1] }
  0x42   :  { %s92_s29 = sld [smem:[#allocation7]]  ;;  %s651_s8 = sld [smem:[#allocation7 + $0x1]] }
  0x43   :  { %s652_s9 = sld [smem:[#allocation3 + $0x2]]  ;;  %s654_s1 = sld [smem:[#allocation3 + $0x3]] }
  0x44   :  { %s957_s2 = sld [smem:[#allocation7 + $0x2]]  ;;  %s959_s10 = sld [smem:[#allocation7 + $0x3]] }
  0x45   :  { %s656_s13 = sld [smem:[#allocation3 + $0x4]]  ;;  %s968_s15 = sld [smem:[#allocation3 + $0x5]] }
  0x46   :  { %s966_s14 = sld [smem:[#allocation7 + $0x4]]  ;;  %s970_s16 = sld [smem:[#allocation7 + $0x5]] }
  0x47   :  { %v90_v1 = vstv %s89_s5  ;;  %s972_s17 = sld [smem:[#allocation3 + $0x6]]  ;;  %v97_v4 = vstv %s650_s30  ;;  %s977_s0 = sld [smem:[#allocation3 + $0x7]] }
  0x48   :  { %v93_v2 = vstv %s92_s29  ;;  %s974_s18 = sld [smem:[#allocation7 + $0x6]]  ;;  %v91_v3 = vmul.f32 %v90_v1, %v964_v0  ;;  %v100_v5 = vstv %s651_s8  ;;  %s979_s19 = sld [smem:[#allocation7 + $0x7]]  ;;  %v98_v6 = vmul.f32 %v97_v4, %v964_v0 }
  0x49   :  { %v104_v7 = vstv %s652_s9  ;;  %s983_s20 = sld [smem:[#allocation3 + $0x8]]  ;;  %v111_v11 = vstv %s654_s1  ;;  %s989_s22 = sld [smem:[#allocation3 + $0x9]] }
  0x4a   :  { %v107_v8 = vstv %s957_s2  ;;  %s985_s21 = sld [smem:[#allocation7 + $0x8]]  ;;  %v94_v9 = vadd.f32 %v93_v2, %v91_v3  ;;  %v105_v10 = vmul.f32 %v104_v7, %v964_v0  ;;  %v114_v12 = vstv %s959_s10  ;;  %s1004_s26 = sld [smem:[#allocation7 + $0x9]] }
  0x4b   :  { %v101_v13 = vadd.f32 %v100_v5, %v98_v6  ;;  %v112_v14 = vmul.f32 %v111_v11, %v964_v0  ;;  %v118_v15 = vstv %s656_s13  ;;  %s993_s23 = sld [smem:[#allocation9]]  ;;  %v125_v18 = vstv %s968_s15  ;;  %s1032_s30 = sld [smem:[#allocation9 + $0x1]] }
  0x4c   :  { %v121_v16 = vstv %s966_s14  ;;  %s995_s4 = sld [smem:[#allocation10]]  ;;  %v119_v17 = vmul.f32 %v118_v15, %v964_v0  ;;  %v108_v19 = vadd.f32 %v107_v8, %v105_v10  ;;  %v126_v20 = vmul.f32 %v125_v18, %v964_v0  ;;  %s1040_s8 = sld [smem:[#allocation10 + $0x1]] }
  0x4d   :  { %s999_s24 = sld [smem:[#allocation9 + $0x80]]  ;;  %v115_v21 = vadd.f32 %v114_v12, %v112_v14  ;;  %v128_v23 = vstv %s970_s16  ;;  %v132_v24 = vstv %s972_s17  ;;  %v1014_v25 = vmax.f32 %v94_v9, 0.0  ;;  %s1042_s9 = sld [smem:[#allocation9 + $0x81]] }
  0x4e   :  { %s1001_s25 = sld [smem:[#allocation9 + $0x100]]  ;;  %v122_v22 = vadd.f32 %v121_v16, %v119_v17  ;;  %v1016_v26 = vmax.f32 %v101_v13, 0.0  ;;  %v133_v27 = vmul.f32 %v132_v24, %v964_v0  ;;  %v139_v28 = vstv %s977_s0  ;;  %s1047_s1 = sld [smem:[#allocation9 + $0x101]] }
  0x4f   :  { %s1006_s27 = sld [smem:[#allocation9 + $0x180]]  ;;  %v135_v29 = vstv %s974_s18  ;;  %v140_v30 = vmul.f32 %v139_v28, %v964_v0  ;;  %v142_v31 = vstv %s979_s19  ;;  %v146_v32 = vstv %s983_s20  ;;  %s1053_s10 = sld [smem:[#allocation9 + $0x181]] }
  0x50   :  { %s1010_s28 = sld [smem:[#allocation9 + $0x200]]  ;;  %v1026_v33 = vmax.f32 %v108_v19, 0.0  ;;  %v129_v34 = vadd.f32 %v128_v23, %v126_v20  ;;  %v147_v35 = vmul.f32 %v146_v32, %v964_v0  ;;  %v149_v36 = vstv %s985_s21  ;;  %s1055_s11 = sld [smem:[#allocation9 + $0x201]] }
  0x51   :  { %s1012_s3 = sld [smem:[#allocation9 + $0x280]]  ;;  %v1034_v37 = vmax.f32 %v115_v21, 0.0  ;;  %v1036_v38 = vmax.f32 %v122_v22, 0.0  ;;  %v153_v39 = vstv %s989_s22  ;;  %v160_v40 = vstv %s993_s23  ;;  %s1061_s12 = sld [smem:[#allocation9 + $0x281]] }
  0x52   :  { %s1024_s5 = sld [smem:[#allocation9 + $0x300]]  ;;  %v136_v41 = vadd.f32 %v135_v29, %v133_v27  ;;  %v143_v42 = vadd.f32 %v142_v31, %v140_v30  ;;  %v150_v43 = vadd.f32 %v149_v36, %v147_v35  ;;  %v161_v44 = vmul.f32 %v160_v40, %v1014_v25  ;;  %s1076_s14 = sld [smem:[#allocation9 + $0x301]] }
  0x53   :  { %s1030_s29 = sld [smem:[#allocation9 + $0x380]]  ;;  %v154_v45 = vmul.f32 %v153_v39, %v964_v0  ;;  %v163_v46 = vstv %s995_s4  ;;  %v166_v47 = vstv %s999_s24  ;;  %v1057_v49 = vmax.f32 %v129_v34, 0.0  ;;  %s1078_s15 = sld [smem:[#allocation9 + $0x2]] }
  0x54   :  { %s1045_s2 = sld [smem:[#allocation9 + $0x400]]  ;;  %v170_v48 = vstv %s1001_s25  ;;  %v156_v50 = vstv %s1004_s26  ;;  %v164_v51 = vadd.f32 %v163_v46, %v161_v44  ;;  %v167_v52 = vmul.f32 %v166_v47, %v1016_v26  ;;  %s1083_s16 = sld [smem:[#allocation9 + $0x381]] }
  0x55   :  { %v171_v53 = vmul.f32 %v170_v48, %v1026_v33  ;;  %v174_v54 = vstv %s1006_s27  ;;  %v1067_v57 = vmax.f32 %v136_v41, 0.0  ;;  %s1070_s13 = sld [smem:[#allocation9 + $0x480]]  ;;  %v1072_v60 = vmax.f32 %v143_v42, 0.0  ;;  %s1085_s17 = sld [smem:[#allocation10 + $0x2]] }
  0x56   :  { %v178_v55 = vstv %s1010_s28  ;;  %v168_v58 = vadd.f32 %v167_v52, %v164_v51  ;;  %v175_v59 = vmul.f32 %v174_v54, %v1034_v37  ;;  %v1074_v61 = vmax.f32 %v150_v43, 0.0  ;;  %s1091_s18 = sld [smem:[#allocation9 + $0x82]]  ;;  %s1104_s20 = sld [smem:[#allocation9 + $0x401]] }
  0x57   :  { %v182_v56 = vstv %s1012_s3  ;;  %v157_v62 = vadd.f32 %v156_v50, %v154_v45  ;;  %v179_v0 = vmul.f32 %v178_v55, %v1036_v38  ;;  %v203_v4 = vstv %s1032_s30  ;;  %s1093_s0 = sld [smem:[#allocation9 + $0x102]]  ;;  %s1117_s23 = sld [smem:[#allocation9 + $0x481]] }
  0x58   :  { %v172_v63 = vadd.f32 %v171_v53, %v168_v58  ;;  %v183_v1 = vmul.f32 %v182_v56, %v1057_v49  ;;  %v186_v2 = vstv %s1024_s5  ;;  %v206_v5 = vstv %s1040_s8  ;;  %s1098_s19 = sld [smem:[#allocation9 + $0x182]]  ;;  %s1127_s25 = sld [smem:[#allocation9 + $0x3]] }
  0x59   :  { %v190_v3 = vstv %s1030_s29  ;;  %v209_v6 = vstv %s1042_s9  ;;  %v204_v9 = vmul.f32 %v203_v4, %v1014_v25  ;;  %v187_v11 = vmul.f32 %v186_v2, %v1067_v57  ;;  %s1106_s21 = sld [smem:[#allocation9 + $0x202]]  ;;  %s1133_s27 = sld [smem:[#allocation10 + $0x3]] }
  0x5a   :  { %v176_v7 = vadd.f32 %v175_v59, %v172_v63  ;;  %v194_v8 = vstv %s1045_s2  ;;  %v210_v10 = vmul.f32 %v209_v6, %v1016_v26  ;;  %v213_v12 = vstv %s1047_s1  ;;  %s1113_s22 = sld [smem:[#allocation9 + $0x282]]  ;;  %s1139_s28 = sld [smem:[#allocation9 + $0x83]] }
  0x5b   :  { %v217_v13 = vstv %s1053_s10  ;;  %v221_v14 = vstv %s1055_s11  ;;  %v207_v16 = vadd.f32 %v206_v5, %v204_v9  ;;  %v214_v17 = vmul.f32 %v213_v12, %v1026_v33  ;;  %s1119_s4 = sld [smem:[#allocation9 + $0x302]]  ;;  %s1141_s3 = sld [smem:[#allocation9 + $0x103]] }
  0x5c   :  { %v180_v15 = vadd.f32 %v179_v0, %v176_v7  ;;  %v225_v18 = vstv %s1061_s12  ;;  %v1110_v19 = vmax.f32 %v157_v62, 0.0  ;;  %v191_v20 = vmul.f32 %v190_v3, %v1072_v60  ;;  %s1125_s24 = sld [smem:[#allocation9 + $0x382]]  ;;  %s1148_s5 = sld [smem:[#allocation9 + $0x183]] }
  0x5d   :  { %v195_v22 = vmul.f32 %v194_v8, %v1074_v61  ;;  %v211_v23 = vadd.f32 %v210_v10, %v207_v16  ;;  %v218_v24 = vmul.f32 %v217_v13, %v1034_v37  ;;  %v198_v27 = vstv %s1070_s13  ;;  %s1131_s26 = sld [smem:[#allocation9 + $0x402]]  ;;  %s1150_s29 = sld [smem:[#allocation9 + $0x203]] }
  0x5e   :  { %v184_v21 = vadd.f32 %v183_v1, %v180_v15  ;;  %v222_v28 = vmul.f32 %v221_v14, %v1036_v38  ;;  %v226_v29 = vmul.f32 %v225_v18, %v1057_v49  ;;  %v246_v30 = vstv %s1078_s15  ;;  %s1154_s30 = sld [smem:[#allocation9 + $0x283]]  ;;  %s1169_s2 = sld [smem:[#allocation9 + $0x482]] }
  0x5f   :  { %v215_v32 = vadd.f32 %v214_v17, %v211_v23  ;;  %v229_v34 = vstv %s1076_s14  ;;  %v249_v35 = vstv %s1085_s17  ;;  %v233_v36 = vstv %s1083_s16  ;;  %s1159_s8 = sld [smem:[#allocation9 + $0x303]]  ;;  %s1172_s1 = sld [smem:[#allocation9 + $0x4]] }
  0x60   :  { %v188_v31 = vadd.f32 %v187_v11, %v184_v21  ;;  %v247_v39 = vmul.f32 %v246_v30, %v1014_v25  ;;  %v252_v40 = vstv %s1091_s18  ;;  %v256_v41 = vstv %s1093_s0  ;;  %s1161_s9 = sld [smem:[#allocation9 + $0x383]]  ;;  %s1183_s11 = sld [smem:[#allocation10 + $0x4]] }
  0x61   :  { %v219_v43 = vadd.f32 %v218_v24, %v215_v32  ;;  %v253_v44 = vmul.f32 %v252_v40, %v1016_v26  ;;  %v260_v45 = vstv %s1098_s19  ;;  %v237_v46 = vstv %s1104_s20  ;;  %s1178_s10 = sld [smem:[#allocation9 + $0x403]]  ;;  %s1185_s12 = sld [smem:[#allocation9 + $0x84]] }
  0x62   :  { %v192_v42 = vadd.f32 %v191_v20, %v188_v31  ;;  %v250_v47 = vadd.f32 %v249_v35, %v247_v39  ;;  %v257_v48 = vmul.f32 %v256_v41, %v1026_v33  ;;  %v264_v50 = vstv %s1106_s21  ;;  %s1190_s13 = sld [smem:[#allocation9 + $0x104]]  ;;  %s1196_s15 = sld [smem:[#allocation9 + $0x483]] }
  0x63   :  { %v199_v51 = vmul.f32 %v198_v27, %v1110_v19  ;;  %v223_v52 = vadd.f32 %v222_v28, %v219_v43  ;;  %v230_v53 = vmul.f32 %v229_v34, %v1067_v57  ;;  %v234_v54 = vmul.f32 %v233_v36, %v1072_v60  ;;  %s1192_s14 = sld [smem:[#allocation9 + $0x184]]  ;;  %s1225_s20 = sld [smem:[#allocation9 + $0x5]] }
  0x64   :  { %v254_v55 = vadd.f32 %v253_v44, %v250_v47  ;;  %v261_v56 = vmul.f32 %v260_v45, %v1034_v37  ;;  %v268_v58 = vstv %s1113_s22  ;;  %v196_v59 = vadd.f32 %v195_v22, %v192_v42  ;;  %s1198_s16 = sld [smem:[#allocation9 + $0x204]]  ;;  %s1227_s21 = sld [smem:[#allocation10 + $0x5]] }
  0x65   :  { %v1164_v62 = vmul.f32 %v237_v46, %v1074_v61  ;;  %v241_v63 = vstv %s1117_s23  ;;  %v265_v0 = vmul.f32 %v264_v50, %v1036_v38  ;;  %v227_v1 = vadd.f32 %v226_v29, %v223_v52  ;;  %s1205_s17 = sld [smem:[#allocation9 + $0x284]]  ;;  %s1234_s23 = sld [smem:[#allocation9 + $0x85]] }
  0x66   :  { %v258_v2 = vadd.f32 %v257_v48, %v254_v55  ;;  %v272_v3 = vstv %s1119_s4  ;;  %v289_v4 = vstv %s1127_s25  ;;  %v269_v5 = vmul.f32 %v268_v58, %v1057_v49  ;;  %s1207_s18 = sld [smem:[#allocation9 + $0x304]]  ;;  %s1239_s4 = sld [smem:[#allocation9 + $0x105]] }
  0x67   :  { %v276_v6 = vstv %s1125_s24  ;;  %v280_v7 = vstv %s1131_s26  ;;  %v290_v8 = vmul.f32 %v289_v4, %v1014_v25  ;;  %v292_v10 = vstv %s1133_s27  ;;  %s1218_s0 = sld [smem:[#allocation9 + $0x384]]  ;;  %s1241_s24 = sld [smem:[#allocation9 + $0x185]] }
  0x68   :  { %v262_v9 = vadd.f32 %v261_v56, %v258_v2  ;;  %v295_v11 = vstv %s1139_s28  ;;  %v299_v12 = vstv %s1141_s3  ;;  %v273_v13 = vmul.f32 %v272_v3, %v1067_v57  ;;  %s1220_s19 = sld [smem:[#allocation9 + $0x404]]  ;;  %s1249_s25 = sld [smem:[#allocation9 + $0x205]] }
  0x69   :  { %v293_v14 = vadd.f32 %v292_v10, %v290_v8  ;;  %v296_v15 = vmul.f32 %v295_v11, %v1016_v26  ;;  %v300_v16 = vmul.f32 %v299_v12, %v1026_v33  ;;  %v231_v17 = vadd.f32 %v230_v53, %v227_v1  ;;  %s1232_s22 = sld [smem:[#allocation9 + $0x484]]  ;;  %s1256_s26 = sld [smem:[#allocation9 + $0x285]] }
  0x6a   :  { %v266_v18 = vadd.f32 %v265_v0, %v262_v9  ;;  %v303_v20 = vstv %s1148_s5  ;;  %v307_v21 = vstv %s1150_s29  ;;  %v1201_v22 = vmul.f32 %v241_v63, %v1110_v19  ;;  %s1261_s27 = sld [smem:[#allocation9 + $0x305]]  ;;  %s1263_s28 = sld [smem:[#allocation9 + $0x6]] }
  0x6b   :  { %v277_v23 = vmul.f32 %v276_v6, %v1072_v60  ;;  %v297_v24 = vadd.f32 %v296_v15, %v293_v14  ;;  %v304_v27 = vmul.f32 %v303_v20, %v1034_v37  ;;  %v311_v29 = vstv %s1154_s30  ;;  %s1268_s3 = sld [smem:[#allocation10 + $0x6]]  ;;  %s1275_s29 = sld [smem:[#allocation9 + $0x385]] }
  0x6c   :  { %v270_v28 = vadd.f32 %v269_v5, %v266_v18  ;;  %v315_v30 = vstv %s1159_s8  ;;  %v319_v31 = vstv %s1161_s9  ;;  %v1212_v32 = vadd.f32 %v199_v51, %v196_v59  ;;  %s1270_s5 = sld [smem:[#allocation9 + $0x86]] }
  0x6d   :  { %v281_v34 = vmul.f32 %v280_v7, %v1074_v61  ;;  %v301_v35 = vadd.f32 %v300_v16, %v297_v24  ;;  %v308_v36 = vmul.f32 %v307_v21, %v1036_v38  ;;  %v235_v39 = vadd.f32 %v234_v54, %v231_v17  ;;  %s1281_s30 = sld [smem:[#allocation9 + $0x106]] }
  0x6e   :  { %v274_v40 = vadd.f32 %v273_v13, %v270_v28  ;;  %v284_v41 = vstv %s1169_s2  ;;  %v332_v42 = vstv %s1172_s1  ;;  %v312_v44 = vmul.f32 %v311_v29, %v1057_v49  ;;  %s1283_s8 = sld [smem:[#allocation9 + $0x186]]  ;;  %s1410_s2 = sld [smem:[#allocation9 + $0x408]] }
  0x6f   :  { %v305_v43 = vadd.f32 %v304_v27, %v301_v35  ;;  %v316_v45 = vmul.f32 %v315_v30, %v1067_v57  ;;  %v320_v46 = vmul.f32 %v319_v31, %v1072_v60  ;;  %v333_v48 = vmul.f32 %v332_v42, %v1014_v25  ;;  %s1291_s9 = sld [smem:[#allocation9 + $0x206]]  ;;  %s1416_s1 = sld [smem:[#allocation9 + $0x9]] }
  0x70   :  { %v278_v47 = vadd.f32 %v277_v23, %v274_v40  ;;  %v335_v50 = vstv %s1183_s11  ;;  %v338_v51 = vstv %s1185_s12  ;;  %v342_v54 = vstv %s1190_s13  ;;  %s1300_s11 = sld [smem:[#allocation9 + $0x306]]  ;;  %s1307_s12 = sld [smem:[#allocation9 + $0x405]] }
  0x71   :  { %v309_v52 = vadd.f32 %v308_v36, %v305_v43  ;;  %v339_v53 = vmul.f32 %v338_v51, %v1016_v26  ;;  %v346_v55 = vstv %s1192_s14  ;;  %v323_v56 = vstv %s1178_s10  ;;  %s1298_s10 = sld [smem:[#allocation9 + $0x286]]  ;;  %s1309_s13 = sld [smem:[#allocation9 + $0x485]] }
  0x72   :  { %v327_v58 = vstv %s1196_s15  ;;  %v336_v59 = vadd.f32 %v335_v50, %v333_v48  ;;  %v343_v63 = vmul.f32 %v342_v54, %v1026_v33  ;;  %v350_v1 = vstv %s1198_s16  ;;  %s1314_s14 = sld [smem:[#allocation9 + $0x386]]  ;;  %s1320_s15 = sld [smem:[#allocation9 + $0x7]] }
  0x73   :  { %v313_v0 = vadd.f32 %v312_v44, %v309_v52  ;;  %v354_v2 = vstv %s1205_s17  ;;  %v358_v3 = vstv %s1207_s18  ;;  %v239_v4 = vadd.f32 %v1164_v62, %v235_v39  ;;  %s1322_s16 = sld [smem:[#allocation10 + $0x7]]  ;;  %s1326_s17 = sld [smem:[#allocation9 + $0x406]] }
  0x74   :  { %v285_v5 = vmul.f32 %v284_v41, %v1110_v19  ;;  %v340_v6 = vadd.f32 %v339_v53, %v336_v59  ;;  %v347_v7 = vmul.f32 %v346_v55, %v1034_v37  ;;  %v282_v8 = vadd.f32 %v281_v34, %v278_v47  ;;  %s1328_s18 = sld [smem:[#allocation9 + $0x87]] }
  0x75   :  { %v317_v9 = vadd.f32 %v316_v45, %v313_v0  ;;  %v324_v10 = vmul.f32 %v323_v56, %v1074_v61  ;;  %v328_v11 = vmul.f32 %v327_v58, %v1110_v19  ;;  %v351_v62 = vmul.f32 %v350_v1, %v1036_v38 }
  0x76   :  { %v344_v12 = vadd.f32 %v343_v63, %v340_v6  ;;  %v355_v13 = vmul.f32 %v354_v2, %v1057_v49  ;;  %v359_v14 = vmul.f32 %v358_v3, %v1067_v57  ;;  %v362_v16 = vstv %s1218_s0  ;;  %s1334_s0 = sld [smem:[#allocation9 + $0x107]] }
  0x77   :  { %v321_v15 = vadd.f32 %v320_v46, %v317_v9  ;;  %v375_v17 = vstv %s1225_s20  ;;  %v378_v18 = vstv %s1227_s21  ;;  %v366_v21 = vstv %s1220_s19  ;;  %s1336_s19 = sld [smem:[#allocation9 + $0x187]] }
  0x78   :  { %v348_v20 = vadd.f32 %v347_v7, %v344_v12  ;;  %v376_v23 = vmul.f32 %v375_v17, %v1014_v25  ;;  %v381_v24 = vstv %s1234_s23  ;;  %v370_v27 = vstv %s1232_s22  ;;  %s1343_s20 = sld [smem:[#allocation9 + $0x207]]  ;;  %s1356_s23 = sld [smem:[#allocation9 + $0x486]] }
  0x79   :  { %v382_v28 = vmul.f32 %v381_v24, %v1016_v26  ;;  %v385_v29 = vstv %s1239_s4  ;;  %v389_v30 = vstv %s1241_s24  ;;  %v325_v31 = vadd.f32 %v324_v10, %v321_v15  ;;  %s1348_s21 = sld [smem:[#allocation9 + $0x287]]  ;;  %s1365_s4 = sld [smem:[#allocation9 + $0x8]] }
  0x7a   :  { %v352_v34 = vadd.f32 %v351_v62, %v348_v20  ;;  %v379_v35 = vadd.f32 %v378_v18, %v376_v23  ;;  %v386_v36 = vmul.f32 %v385_v29, %v1026_v33  ;;  %v201_v39 = vmax.f32 %v1212_v32, 0.0  ;;  %s1350_s22 = sld [smem:[#allocation9 + $0x307]]  ;;  %s1367_s24 = sld [smem:[#allocation10 + $0x8]] }
  0x7b   :  { %v1288_v40 = vadd.f32 %v1201_v22, %v239_v4  ;;  %v393_v41 = vstv %s1249_s25  ;;  %v593_v42 = vstv %s1547_s6  ;;  %v363_v44 = vmul.f32 %v362_v16, %v1072_v60  ;;  %s1372_s25 = sld [smem:[#allocation9 + $0x387]]  ;;  %s784_s6 = sld [smem:[#allocation11 + $0x9]] }
  0x7c   :  { %v356_v43 = vadd.f32 %v355_v13, %v352_v34  ;;  %v383_v45 = vadd.f32 %v382_v28, %v379_v35  ;;  %v390_v46 = vmul.f32 %v389_v30, %v1034_v37  ;;  %v1302_v22 = vadd.f32 %v285_v5, %v282_v8 }
  0x7d   :  { %v367_v47 = vmul.f32 %v366_v21, %v1074_v61  ;;  %v371_v48 = vmul.f32 %v370_v27, %v1110_v19  ;;  %v397_v50 = vstv %s1256_s26  ;;  %v1311_v51 = vadd.f32 %v328_v11, %v325_v31  ;;  %s1374_s26 = sld [smem:[#allocation9 + $0x88]] }
  0x7e   :  { %v360_v52 = vadd.f32 %v359_v14, %v356_v43  ;;  %v387_v53 = vadd.f32 %v386_v36, %v383_v45  ;;  %v394_v54 = vmul.f32 %v393_v41, %v1036_v38  ;;  %v401_v55 = vstv %s1261_s27  ;;  %s1380_s27 = sld [smem:[#allocation9 + $0x108]] }
  0x7f   :  { %v418_v56 = vstv %s1263_s28  ;;  %v421_v58 = vstv %s1268_s3  ;;  %v424_v59 = vstv %s1270_s5  ;;  %v398_v1 = vmul.f32 %v397_v50, %v1057_v49  ;;  %s1382_s28 = sld [smem:[#allocation9 + $0x188]]  ;;  %s1385_s3 = sld [smem:[#allocation9 + $0x407]] }
  0x80   :  { %v364_v63 = vadd.f32 %v363_v44, %v360_v52  ;;  %v391_v0 = vadd.f32 %v390_v46, %v387_v53  ;;  %v419_v2 = vmul.f32 %v418_v56, %v1014_v25  ;;  %v405_v3 = vstv %s1275_s29  ;;  %s1393_s5 = sld [smem:[#allocation9 + $0x208]] }
  0x81   :  { %v425_v4 = vmul.f32 %v424_v59, %v1016_v26  ;;  %v428_v5 = vstv %s1281_s30  ;;  %v432_v6 = vstv %s1283_s8  ;;  %v244_v11 = vmax.f32 %v1288_v40, 0.0  ;;  %s1395_s29 = sld [smem:[#allocation9 + $0x288]]  ;;  %s1405_s8 = sld [smem:[#allocation9 + $0x487]] }
  0x82   :  { %v368_v7 = vadd.f32 %v367_v47, %v364_v63  ;;  %v395_v8 = vadd.f32 %v394_v54, %v391_v0  ;;  %v422_v9 = vadd.f32 %v421_v58, %v419_v2  ;;  %v429_v10 = vmul.f32 %v428_v5, %v1026_v33  ;;  %s1399_s30 = sld [smem:[#allocation9 + $0x308]] }
  0x83   :  { %v287_v12 = vmax.f32 %v1302_v22, 0.0  ;;  %v330_v62 = vmax.f32 %v1311_v51, 0.0  ;;  %v436_v13 = vstv %s1291_s9  ;;  %v433_v15 = vmul.f32 %v432_v6, %v1034_v37  ;;  %s1408_s9 = sld [smem:[#allocation9 + $0x388]] }
  0x84   :  { %v426_v14 = vadd.f32 %v425_v4, %v422_v9  ;;  %v440_v16 = vstv %s1298_s10  ;;  %v444_v17 = vstv %s1300_s11  ;;  %v402_v18 = vmul.f32 %v401_v55, %v1067_v57  ;;  %s1418_s10 = sld [smem:[#allocation10 + $0x9]]  ;;  %s1423_s11 = sld [smem:[#allocation9 + $0x488]] }
  0x85   :  { %v406_v20 = vmul.f32 %v405_v3, %v1072_v60  ;;  %v409_v21 = vstv %s1307_s12  ;;  %v413_v23 = vstv %s1309_s13  ;;  %v1358_v24 = vadd.f32 %v371_v48, %v368_v7  ;;  %s1425_s12 = sld [smem:[#allocation9 + $0x89]] }
  0x86   :  { %v399_v27 = vadd.f32 %v398_v1, %v395_v8  ;;  %v430_v28 = vadd.f32 %v429_v10, %v426_v14  ;;  %v437_v29 = vmul.f32 %v436_v13, %v1036_v38  ;;  %v441_v30 = vmul.f32 %v440_v16, %v1057_v49  ;;  %s1430_s13 = sld [smem:[#allocation9 + $0x109]] }
  0x87   :  { %v445_v31 = vmul.f32 %v444_v17, %v1067_v57  ;;  %v461_v34 = vstv %s1320_s15  ;;  %v464_v35 = vstv %s1322_s16  ;;  %v448_v41 = vstv %s1314_s14  ;;  %s1432_s14 = sld [smem:[#allocation9 + $0x189]] }
  0x88   :  { %v434_v36 = vadd.f32 %v433_v15, %v430_v28  ;;  %v462_v43 = vmul.f32 %v461_v34, %v1014_v25  ;;  %v467_v44 = vstv %s1328_s18  ;;  %v452_v45 = vstv %s1326_s17  ;;  %s1439_s15 = sld [smem:[#allocation9 + $0x209]]  ;;  %s1456_s18 = sld [smem:[#allocation11]] }
  0x89   :  { %v468_v46 = vmul.f32 %v467_v44, %v1016_v26  ;;  %v471_v47 = vstv %s1334_s0  ;;  %v475_v48 = vstv %s1336_s19  ;;  %v403_v50 = vadd.f32 %v402_v18, %v399_v27  ;;  %s1443_s16 = sld [smem:[#allocation9 + $0x289]] }
  0x8a   :  { %v438_v52 = vadd.f32 %v437_v29, %v434_v36  ;;  %v465_v53 = vadd.f32 %v464_v35, %v462_v43  ;;  %v472_v54 = vmul.f32 %v471_v47, %v1026_v33  ;;  %v410_v55 = vmul.f32 %v409_v21, %v1074_v61  ;;  %s1445_s17 = sld [smem:[#allocation9 + $0x309]] }
  0x8b   :  { %v1389_v56 = vmul.f32 %v413_v23, %v1110_v19  ;;  %v476_v58 = vmul.f32 %v475_v48, %v1034_v37  ;;  %v479_v59 = vstv %s1343_s20  ;;  %v483_v1 = vstv %s1348_s21  ;;  %s1458_s0 = sld [smem:[#allocation11 + $0x1]]  ;;  %s1471_s21 = sld [smem:[#allocation11 + $0x2]] }
  0x8c   :  { %v442_v63 = vadd.f32 %v441_v30, %v438_v52  ;;  %v469_v0 = vadd.f32 %v468_v46, %v465_v53  ;;  %v487_v2 = vstv %s1350_s22  ;;  %v373_v3 = vmax.f32 %v1358_v24, 0.0  ;;  %s1463_s19 = sld [smem:[#allocation9 + $0x389]]  ;;  %s1473_s22 = sld [smem:[#allocation11 + $0x3]] }
  0x8d   :  { %v449_v4 = vmul.f32 %v448_v41, %v1072_v60  ;;  %v453_v5 = vmul.f32 %v452_v45, %v1074_v61  ;;  %v456_v6 = vstv %s1356_s23  ;;  %v407_v7 = vadd.f32 %v406_v20, %v403_v50  ;;  %s1465_s20 = sld [smem:[#allocation9 + $0x409]]  ;;  %s1480_s23 = sld [smem:[#allocation11 + $0x4]] }
  0x8e   :  { %v446_v8 = vadd.f32 %v445_v31, %v442_v63  ;;  %v473_v9 = vadd.f32 %v472_v54, %v469_v0  ;;  %v480_v10 = vmul.f32 %v479_v59, %v1036_v38  ;;  %v484_v13 = vmul.f32 %v483_v1, %v1057_v49 }
  0x8f   :  { %v488_v14 = vmul.f32 %v487_v2, %v1067_v57  ;;  %v504_v15 = vstv %s1365_s4  ;;  %v507_v16 = vstv %s1367_s24  ;;  %v491_v18 = vstv %s1372_s25  ;;  %s1487_s4 = sld [smem:[#allocation9 + $0x489]]  ;;  %s1489_s24 = sld [smem:[#allocation11 + $0x5]] }
  0x90   :  { %v477_v17 = vadd.f32 %v476_v58, %v473_v9  ;;  %v505_v20 = vmul.f32 %v504_v15, %v1014_v25  ;;  %v510_v21 = vstv %s1374_s26  ;;  %v450_v23 = vadd.f32 %v449_v4, %v446_v8  ;;  %s1496_s25 = sld [smem:[#allocation11 + $0x6]]  ;;  %s1506_s26 = sld [smem:[#allocation11 + $0x7]] }
  0x91   :  { %v511_v27 = vmul.f32 %v510_v21, %v1016_v26  ;;  %v514_v28 = vstv %s1380_s27  ;;  %v518_v29 = vstv %s1382_s28  ;;  %v495_v31 = vstv %s1385_s3  ;;  %s1515_s3 = sld [smem:[#allocation11 + $0x8]] }
  0x92   :  { %v481_v30 = vadd.f32 %v480_v10, %v477_v17  ;;  %v508_v34 = vadd.f32 %v507_v16, %v505_v20  ;;  %v515_v35 = vmul.f32 %v514_v28, %v1026_v33  ;;  %v411_v36 = vadd.f32 %v410_v55, %v407_v7 }
  0x93   :  { %v457_v41 = vmul.f32 %v456_v6, %v1110_v19  ;;  %v522_v43 = vstv %s1393_s5  ;;  %v526_v44 = vstv %s1395_s29  ;;  %v519_v47 = vmul.f32 %v518_v29, %v1034_v37  ;;  %s892_s5 = smov [#allocation13]  }
  0x94   :  { %v485_v45 = vadd.f32 %v484_v13, %v481_v30  ;;  %v512_v46 = vadd.f32 %v511_v27, %v508_v34  ;;  %v530_v48 = vstv %s1399_s30  ;;  %v454_v50 = vadd.f32 %v453_v5, %v450_v23  ;;  %s638_s29 = sshll.u32 %s892_s5, 4  ;;  %s639_s29 = int_to_ptr.vmem [resolvable:$true] %s638_s29 }
  0x95   :  { %v492_v52 = vmul.f32 %v491_v18, %v1072_v60  ;;  %v496_v53 = vmul.f32 %v495_v31, %v1074_v61  ;;  %v499_v54 = vstv %s1405_s8  ;;  %v523_v59 = vmul.f32 %v522_v43, %v1036_v38  ;;  %s851_s30 = scalar_lea.vmem %s639_s29, 16  ;;  %s855_s8 = scalar_lea.vmem %s639_s29, 32 }
  0x96   :  { %v489_v55 = vadd.f32 %v488_v14, %v485_v45  ;;  %v516_v58 = vadd.f32 %v515_v35, %v512_v46  ;;  %v527_v63 = vmul.f32 %v526_v44, %v1057_v49  ;;  %v531_v0 = vmul.f32 %v530_v48, %v1067_v57  ;;  %p852_p9 = scmp.ne.s32.totalorder %s639_s29, %s851_s30  ;;  %p856_p10 = scmp.lt.s32.totalorder %s639_s29, %s639_s29 }
  0x97   :  { %v534_v1 = vstv %s1408_s9  ;;  %v547_v2 = vstv %s1416_s1  ;;  %v550_v4 = vstv %s1418_s10  ;;  %v538_v6 = vstv %s1410_s2  ;;  %p857_p11 = scmp.lt.s32.totalorder %s855_s8, %s851_s30 }
  0x98   :  { %v520_v5 = vadd.f32 %v519_v47, %v516_v58  ;;  %v548_v7 = vmul.f32 %v547_v2, %v1014_v25  ;;  %v553_v8 = vstv %s1425_s12  ;;  %v542_v9 = vstv %s1423_s11 }
  0x99   :  { %v554_v10 = vmul.f32 %v553_v8, %v1016_v26  ;;  %v557_v13 = vstv %s1430_s13  ;;  %v561_v14 = vstv %s1432_s14  ;;  %v493_v15 = vadd.f32 %v492_v52, %v489_v55  ;;  %p858_p12 = por %p857_p11, %p856_p10 }
  0x9a   :  { %v524_v16 = vadd.f32 %v523_v59, %v520_v5  ;;  %v551_v25 = vadd.f32 %v550_v4, %v548_v7  ;;  %v558_v17 = vmul.f32 %v557_v13, %v1026_v33  ;;  %v415_v18 = vadd.f32 %v1389_v56, %v411_v36 }
  0x9b   :  { %v535_v20 = vmul.f32 %v534_v1, %v1072_v60  ;;  %v562_v21 = vmul.f32 %v561_v14, %v1034_v37  ;;  %v565_v26 = vstv %s1439_s15  ;;  %v569_v28 = vstv %s1443_s16  ;;  %p859_p13 = pnand %p858_p12, %p852_p9 }
  0x9c   :  { %v528_v23 = vadd.f32 %v527_v63, %v524_v16  ;;  %v555_v27 = vadd.f32 %v554_v10, %v551_v25  ;;  %v573_v29 = vstv %s1445_s17  ;;  %v458_v30 = vadd.f32 %v457_v41, %v454_v50 }
  0x9d   :  { %v500_v31 = vmul.f32 %v499_v54, %v1110_v19  ;;  %v539_v33 = vmul.f32 %v538_v6, %v1074_v61  ;;  %v543_v56 = vmul.f32 %v542_v9, %v1110_v19  ;;  %v497_v37 = vadd.f32 %v496_v53, %v493_v15 }
  0x9e   :  { %v532_v34 = vadd.f32 %v531_v0, %v528_v23  ;;  %v559_v35 = vadd.f32 %v558_v17, %v555_v27  ;;  %v566_v36 = vmul.f32 %v565_v26, %v1036_v38  ;;  %v570_v41 = vmul.f32 %v569_v28, %v1057_v49 }
  0x9f   :  { %v574_v43 = vmul.f32 %v573_v29, %v1067_v57  ;;  %v590_v44 = vstv %s1456_s18  ;;  %v596_v45 = vstv %s1458_s0  ;;  %v577_v52 = vstv %s1463_s19 }
  0xa0   :  { %v536_v46 = vadd.f32 %v535_v20, %v532_v34  ;;  %v563_v47 = vadd.f32 %v562_v21, %v559_v35  ;;  %v591_v48 = vmul.f32 %v590_v44, %v201_v39  ;;  %v597_v50 = vmul.f32 %v596_v45, %v244_v11 }
  0xa1   :  { %v581_v53 = vstv %s1465_s20  ;;  %v600_v38 = vstv %s1471_s21  ;;  %v604_v54 = vstv %s1473_s22  ;;  %v416_v39 = vmax.f32 %v415_v18, 0.0 }
  0xa2   :  { %v540_v49 = vadd.f32 %v539_v33, %v536_v46  ;;  %v567_v57 = vadd.f32 %v566_v36, %v563_v47  ;;  %v594_v55 = vadd.f32 %v593_v42, %v591_v48  ;;  %v601_v32 = vmul.f32 %v600_v38, %v287_v12 }
  0xa3   :  { %v501_v40 = vadd.f32 %v500_v31, %v497_v37  ;;  %v608_v11 = vstv %s1480_s23  ;;  %v578_v59 = vmul.f32 %v577_v52, %v1072_v60  ;;  %v605_v0 = vmul.f32 %v604_v54, %v330_v62 }
  0xa4   :  { %v571_v58 = vadd.f32 %v570_v41, %v567_v57  ;;  %v598_v63 = vadd.f32 %v597_v50, %v594_v55  ;;  %v459_v1 = vmax.f32 %v458_v30, 0.0  ;;  %v582_v42 = vmul.f32 %v581_v53, %v1074_v61 }
  0xa5   :  { %v585_v2 = vstv %s1487_s4  ;;  %v612_v22 = vstv %s1489_s24  ;;  %v544_v12 = vadd.f32 %v543_v56, %v540_v49  ;;  %v609_v6 = vmul.f32 %v608_v11, %v373_v3 }
  0xa6   :  { %v575_v4 = vadd.f32 %v574_v43, %v571_v58  ;;  %v602_v5 = vadd.f32 %v601_v32, %v598_v63  ;;  %v502_v7 = vmax.f32 %v501_v40, 0.0  ;;  %v616_v60 = vstv %s1496_s25 }
  0xa7   :  { %v586_v51 = vmul.f32 %v585_v2, %v1110_v19  ;;  %v613_v9 = vmul.f32 %v612_v22, %v416_v39  ;;  %v620_v10 = vstv %s1506_s26  ;;  %v545_v13 = vmax.f32 %v544_v12, 0.0 }
  0xa8   :  { %v579_v8 = vadd.f32 %v578_v59, %v575_v4  ;;  %v606_v62 = vadd.f32 %v605_v0, %v602_v5  ;;  %v617_v15 = vmul.f32 %v616_v60, %v459_v1  ;;  %v624_v16 = vstv %s1515_s3 }
  0xa9   :  { %v621_v18 = vmul.f32 %v620_v10, %v502_v7  ;;  %v628_v20 = vstv %s784_s6  ;;  %v625_v3 = vmul.f32 %v624_v16, %v545_v13 }
  0xaa   :  { %v583_v61 = vadd.f32 %v582_v42, %v579_v8  ;;  %v610_v14 = vadd.f32 %v609_v6, %v606_v62 }
  0xac   :  { %v587_v25 = vadd.f32 %v586_v51, %v583_v61  ;;  %v614_v17 = vadd.f32 %v613_v9, %v610_v14 }
  0xae   :  { %v588_v21 = vmax.f32 %v587_v25, 0.0  ;;  %v618_v24 = vadd.f32 %v617_v15, %v614_v17 }
  0xb0   :  { %v622_v26 = vadd.f32 %v621_v18, %v618_v24  ;;  %v629_v23 = vmul.f32 %v628_v20, %v588_v21 }
  0xb2   :  { %v626_v19 = vadd.f32 %v625_v3, %v622_v26 }
  0xb4   :  { %v630_v27 = vadd.f32 %v629_v23, %v626_v19 }
  0xb6   :  { %631 = vst [vmem:[#allocation13] sm:$0x1] %v630_v27 }
  0xb7   :  { %862 = shalt.err (!%p859_p13)
}
  0xb8   :  { %s863_s1 = scalar_lea.hbm %s1548_s7, 16 }
  0xb9   :  { %p864_p0 = scmp.ne.s32.totalorder %s1548_s7, %s863_s1  ;;  %p867_p1 = scmp.lt.u32.totalorder %s863_s1, %s1548_s7 }
  0xbb   :  { %p869_p2 = pnand %p867_p1, %p864_p0 }
  0xbd   :  { %872 = shalt.err (!%p869_p2)
}
  0xbe   :  { %641 = dma.vmem_to_hbm [thread:$0]  %s639_s29, 16, %s1548_s7, [#allocation4]  }
  0xbf   :  { %883 = dma.done.wait [#allocation4], 16  }
  0xc0   :  { %884 = vsyncadd [#allocation4], 4294967280 }
  0xc1   :  { %645 = vsyncpa [#allocation4], 1 }
  0xc2   :  { %646 = vsyncpa [#allocation5], 1 }
  0xc3   :  { %647 = vsyncpa [#allocation6], 1 }
  0xc4   :  { %648 = vsyncpa [#allocation8], 1 }
  0xc5   :  { %649 = vsyncpa [#allocation12], 1 }

</bundles_post_ra>
